<compile_context>
chip_gen: v7x
topology: tpu7x:2x2x1
jax: 0.10.0
libtpu: 0.0.40
codegen_flags: <defaults>
</compile_context>

<pallas_src>
import functools
import math

import numpy as np
import jax
import jax.numpy as jnp
from jax import lax
from jax.experimental import pallas as pl
from jax.experimental.pallas import tpu as pltpu

EPS = 1e-5      # nn.LayerNorm default
LANE = 128
DUR_PAD = 128   # lane-dense width for the (S, 1) log-duration output


# ----------------------------------------------------------------------------
# traced helpers (pure jnp, used inside the kernels)
# ----------------------------------------------------------------------------
def _dot(a, b):
    """bf16 x bf16 MXU matmul with f32 accumulation."""
    return jnp.dot(a.astype(jnp.bfloat16), b.astype(jnp.bfloat16),
                   preferred_element_type=jnp.float32)


def _layernorm(y, gamma, beta):
    # single-pass stats: var = E[y^2] - mu^2 (clamped against cancellation)
    mu = jnp.mean(y, axis=-1, keepdims=True)
    ms = jnp.mean(y * y, axis=-1, keepdims=True)
    var = jnp.maximum(ms - mu * mu, 0.0)
    return (y - mu) * lax.rsqrt(var + EPS) * gamma + beta


def _conv1d_same(x, taps, bias, seq):
    """'same' Conv1d over flattened (bblk*seq, Cin) rows.

    Tap k needs x[t + k - pad]; the shifted view is built with a sublane
    pltpu.roll (XLU slot, otherwise idle) plus an iota mask that zeroes rows
    whose source index falls outside [0, seq) of their own sample -- which
    also removes any cross-sample bleed in the flattened row layout.
    The centre tap seeds `out` (no zeros broadcast, no halo scratch).
    """
    rows = x.shape[0]
    ks = len(taps)
    pad = (ks - 1) // 2
    out = _dot(x, taps[pad]) + bias
    if ks > 1:
        t = lax.broadcasted_iota(jnp.int32, (rows, 1), 0) % seq
        for k in range(ks):
            if k == pad:
                continue
            d = k - pad
            shifted = pltpu.roll(x, shift=(-d) % rows, axis=0)
            valid = jnp.logical_and(t + d >= 0, t + d < seq)
            out = out + _dot(jnp.where(valid, shifted, 0.0), taps[k])
    return out


def _fft_block(x, wkqv, bkqv, wproj, bproj, ag, ab,
               wc1_taps, bc1, wc2_taps, bc2, cg, cb, *, nheads, bblk, seq):
    """SelfAttention + ResConv (one FeedForwardTransformer block), fused.

    x is the flattened (bblk*seq, H) row slab; attention runs per sample /
    per head (static tiny loops), everything else on the full slab.
    """
    rows, H = x.shape
    dh = H // nheads

    # ---- SelfAttention: QKV packed [Q_all | K_all | V_all], scale folded ---
    qkv = _dot(x, wkqv) + bkqv                             # (rows, 3H) f32
    parts = []
    for b in range(bblk):
        r0 = b * seq
        acc = None
        for h in range(nheads):
            c0 = h * dh
            q = qkv[r0:r0 + seq, c0:c0 + dh]
            k = qkv[r0:r0 + seq, H + c0:H + c0 + dh]
            v = qkv[r0:r0 + seq, 2 * H + c0:2 * H + c0 + dh]
            s = lax.dot_general(q.astype(jnp.bfloat16), k.astype(jnp.bfloat16),
                                (((1,), (1,)), ((), ())),
                                preferred_element_type=jnp.float32)
            s = s - jnp.max(s, axis=-1, keepdims=True)
            p = jnp.exp(s)
            p = p * pl.reciprocal(jnp.sum(p, axis=-1, keepdims=True), approx=True)
            head = _dot(p, v)
            # fold the head-concat into the output projection (no lane concat)
            proj = _dot(head, wproj[c0:c0 + dh, :])
            acc = proj if acc is None else acc + proj
        parts.append(acc)
    # TODO(synk): for very long mel sequences (T ~ 2k+) tile this over KV
    # chunks (online softmax) instead of the full (seq, seq) score tile.
    att = parts[0] if bblk == 1 else jnp.concatenate(parts, axis=0)
    x = _layernorm(att + bproj + x, ag, ab)

    # ---- ResConv: relu(conv1) -> relu(conv2) -> +residual -> LayerNorm -----
    h1 = jnp.maximum(_conv1d_same(x, wc1_taps, bc1, seq), 0.0)
    h2 = jnp.maximum(_conv1d_same(h1, wc2_taps, bc2, seq), 0.0)
    return _layernorm(h2 + x, cg, cb)


# ----------------------------------------------------------------------------
# fused Pallas kernels  (grid = (batch_blocks, nblocks), block axis streamed)
# ----------------------------------------------------------------------------
def _pho_stack_kernel(x_ref, pos_ref,
                      wkqv, bkqv, wproj, bproj, ag, ab,
                      wc1, bc1, wc2, bc2, cg, cb,
                      dw1, db1, dg1, dbe1, dw2, db2, dg2, dbe2, dwl, dbl,
                      xo_ref, dur_ref, carry,
                      *, nblocks, nheads, bblk, seq, ks, ks_v):
    rows = bblk * seq
    H = x_ref.shape[-1]
    blk = pl.program_id(1)

    @pl.when(blk == 0)
    def _():                                              # pos-add rides for free
        carry[...] = (x_ref[...] + pos_ref[...]).reshape(rows, H)

    x = _fft_block(
        carry[...],
        wkqv[0], bkqv[0], wproj[0], bproj[0], ag[0], ab[0],
        [wc1[0, t] for t in range(ks)], bc1[0],
        [wc2[0, t] for t in range(ks)], bc2[0],
        cg[0], cb[0],
        nheads=nheads, bblk=bblk, seq=seq)
    carry[...] = x

    @pl.when(blk == nblocks - 1)
    def _():
        xo_ref[...] = x.reshape(bblk, seq, H)
        # duration predictor sees x.detach() in the reference: same fwd values
        h = jnp.maximum(_conv1d_same(x, [dw1[t] for t in range(ks_v)],
                                     db1[...], seq), 0.0)
        h = _layernorm(h, dg1[...], dbe1[...])
        g = jnp.maximum(_conv1d_same(h, [dw2[t] for t in range(ks_v)],
                                     db2[...], seq), 0.0)
        g = _layernorm(g, dg2[...], dbe2[...])
        dur = _dot(g, dwl[...]) + dbl[...]                # lane-dense (rows, 128)
        dur_ref[...] = dur.reshape(bblk, seq, dur_ref.shape[-1])


def _mel_stack_kernel(x_ref, pos_ref,
                      wkqv, bkqv, wproj, bproj, ag, ab,
                      wc1, bc1, wc2, bc2, cg, cb,
                      wlin, blin,
                      o_ref, carry,
                      *, nblocks, nheads, bblk, seq, ks):
    rows = bblk * seq
    H = x_ref.shape[-1]
    blk = pl.program_id(1)

    @pl.when(blk == 0)
    def _():
        carry[...] = (x_ref[...] + pos_ref[...]).reshape(rows, H)

    x = _fft_block(
        carry[...],
        wkqv[0], bkqv[0], wproj[0], bproj[0], ag[0], ab[0],
        [wc1[0, t] for t in range(ks)], bc1[0],
        [wc2[0, t] for t in range(ks)], bc2[0],
        cg[0], cb[0],
        nheads=nheads, bblk=bblk, seq=seq)
    carry[...] = x

    @pl.when(blk == nblocks - 1)
    def _():
        out = _dot(x, wlin[...]) + blin[...]              # lane-dense (rows, nout_pad)
        o_ref[...] = out.reshape(bblk, seq, o_ref.shape[-1])


# ----------------------------------------------------------------------------
# pallas_call wrappers
# ----------------------------------------------------------------------------
_FFT_KEYS = ("wkqv", "bkqv", "wproj", "bproj", "ag", "ab",
             "wc1", "bc1", "wc2", "bc2", "cg", "cb")
_DP_KEYS = ("w1", "b1", "g1", "be1", "w2", "b2", "g2", "be2", "wl", "bl")


def _const_spec(shape):
    # grid-invariant operand (fetched once; could additionally be
    # single-buffered via pipeline_mode=pl.Buffered(1))
    n = len(shape)
    return pl.BlockSpec(tuple(shape), lambda i, k, _n=n: (0,) * _n)


def _stream_spec(shape):
    # per-transformer-block operand, streamed along the 'arbitrary' grid axis
    n = len(shape)
    return pl.BlockSpec((1,) + tuple(shape[1:]),
                        lambda i, k, _n=n: (k,) + (0,) * (_n - 1))


def _pick_bblk(batch, seq, target_rows=128):
    # Flatten enough samples per grid step for ~target_rows matmul rows
    # (amortizes per-step overhead, feeds the MXU a useful M).
    # NOTE(v7x): with tiny batches this can leave the 2nd TensorCore idle;
    # cap at batch//2 there if 2-TC occupancy matters more than row count.
    cap = max(1, target_rows // max(seq, 1))
    best = 1
    for d in range(1, batch + 1):
        if batch % d == 0 and d <= cap:
            best = d
    return best


def _vmem_limit(arrays, out_shapes, scratch_bytes):
    nbytes = sum(int(a.size) * a.dtype.itemsize for a in arrays)
    nbytes += sum(int(np.prod(o.shape)) * np.dtype(o.dtype).itemsize
                  for o in out_shapes)
    need = 2 * nbytes + scratch_bytes + (4 << 20)   # generous: everything x2
    return int(min(48 << 20, max(32 << 20, need)))


def pho_stack(x_emb, pos, fft, dp, cfg):
    B, S, H = x_emb.shape
    nblocks, nheads, ks, ks_v = cfg["nblocks"], cfg["nheads"], cfg["ks"], cfg["ks_v"]
    bblk = _pick_bblk(B, S)
    fft_ws = [fft[k] for k in _FFT_KEYS]
    dp_ws = [dp[k] for k in _DP_KEYS]
    out_shapes = (jax.ShapeDtypeStruct((B, S, H), jnp.float32),
                  jax.ShapeDtypeStruct((B, S, DUR_PAD), jnp.float32))
    scratch_bytes = bblk * S * H * 4

    x_out, dur = pl.pallas_call(
        functools.partial(_pho_stack_kernel, nblocks=nblocks, nheads=nheads,
                          bblk=bblk, seq=S, ks=ks, ks_v=ks_v),
        out_shape=out_shapes,
        grid=(B // bblk, nblocks),
        in_specs=[pl.BlockSpec((bblk, S, H), lambda i, k: (i, 0, 0)),
                  _const_spec(pos.shape)]
                 + [_stream_spec(w.shape) for w in fft_ws]
                 + [_const_spec(w.shape) for w in dp_ws],
        out_specs=(pl.BlockSpec((bblk, S, H), lambda i, k: (i, 0, 0)),
                   pl.BlockSpec((bblk, S, DUR_PAD), lambda i, k: (i, 0, 0))),
        scratch_shapes=[pltpu.VMEM((bblk * S, H), jnp.float32)],
        compiler_params=pltpu.CompilerParams(
            dimension_semantics=("parallel", "arbitrary"),
            vmem_limit_bytes=_vmem_limit([x_emb, pos] + fft_ws + dp_ws,
                                         out_shapes, scratch_bytes)),
    )(x_emb, pos, *fft_ws, *dp_ws)
    return x_out, dur[..., 0]                              # .squeeze(-1)


def mel_stack(x_reg, pos, fft, lin, cfg):
    B, T, H = x_reg.shape
    nblocks, nheads, ks = cfg["nblocks"], cfg["nheads"], cfg["ks"]
    bblk = _pick_bblk(B, T)
    nout_pad = lin["w"].shape[-1]
    fft_ws = [fft[k] for k in _FFT_KEYS]
    out_shape = jax.ShapeDtypeStruct((B, T, nout_pad), jnp.float32)
    scratch_bytes = bblk * T * H * 4

    return pl.pallas_call(
        functools.partial(_mel_stack_kernel, nblocks=nblocks, nheads=nheads,
                          bblk=bblk, seq=T, ks=ks),
        out_shape=out_shape,
        grid=(B // bblk, nblocks),
        in_specs=[pl.BlockSpec((bblk, T, H), lambda i, k: (i, 0, 0)),
                  _const_spec(pos.shape)]
                 + [_stream_spec(w.shape) for w in fft_ws]
                 + [_const_spec(lin["w"].shape), _const_spec(lin["b"].shape)],
        out_specs=pl.BlockSpec((bblk, T, nout_pad), lambda i, k: (i, 0, 0)),
        scratch_shapes=[pltpu.VMEM((bblk * T, H), jnp.float32)],
        compiler_params=pltpu.CompilerParams(
            dimension_semantics=("parallel", "arbitrary"),
            vmem_limit_bytes=_vmem_limit([x_reg, pos] + fft_ws
                                         + [lin["w"], lin["b"]],
                                         (out_shape,), scratch_bytes)),
    )(x_reg, pos, *fft_ws, lin["w"], lin["b"])


# ----------------------------------------------------------------------------
# plain-JAX / host glue
# ----------------------------------------------------------------------------
@functools.lru_cache(maxsize=None)
def positional_embeddings(seq_len, d_model):
    # Exact reproduction of the reference (angle[i, pos] = pos / 10000**(2*i/d),
    # even ROWS sin, odd ROWS cos).  Precomputed host-side once per shape.
    pos = np.arange(d_model, dtype=np.float64)[None, :]
    i = np.arange(seq_len, dtype=np.float64)[:, None]
    angle = pos / np.power(10000.0, 2.0 * i / float(d_model))
    emb = np.where((np.arange(seq_len)[:, None] % 2) == 0,
                   np.sin(angle), np.cos(angle))
    return jnp.asarray(emb, dtype=jnp.float32)


def length_regulator(x, durations_np, upsample_ratio):
    """Single XLA gather with host-precomputed repeat indices.

    Matches the reference: T = durations[0].sum(); adjusted durations truncate
    like torch .to(torch.int).  Rows whose repeat length differs from T are
    truncated / edge-padded (the reference would raise in that case).
    """
    B, S, _ = x.shape
    dur = np.asarray(durations_np)
    adjusted = (upsample_ratio * dur).astype(np.int32)
    T = int(dur[0].sum())
    gidx = np.zeros((B, T), np.int32)
    for i in range(B):
        r = np.repeat(np.arange(S, dtype=np.int32), adjusted[i])[:T]
        if r.shape[0] < T:
            r = np.pad(r, (0, T - r.shape[0]), mode="edge")
        gidx[i] = r
    return x[jnp.arange(B)[:, None], jnp.asarray(gidx)]     # (B, T, H)


def fastspeech_forward(params, tokens, durations_np, upsample_ratio=1.0,
                       dur_train=False):
    cfg = params["cfg"]
    B, S = tokens.shape
    H = params["emb"].shape[1]

    x = params["emb"][tokens]                               # embedding gather
    x, log_dur = pho_stack(x, positional_embeddings(S, H),
                           params["fft_pho"], params["durpred"], cfg)

    # training-mode behaviour: use the provided durations.
    # TODO(synk): eval-mode path (durations = exp(log_dur)) implies a
    # data-dependent output length, not expressible with static Pallas shapes.
    x = length_regulator(x, durations_np, upsample_ratio)   # (B, T, H)
    T = x.shape[1]
    mel = mel_stack(x, positional_embeddings(T, H),
                    params["fft_mel"], params["linear"], cfg)
    mel = jnp.transpose(mel[..., :params["linear"]["nout"]], (0, 2, 1))
    return (mel, log_dur) if dur_train else mel


# ----------------------------------------------------------------------------
# parameter init + packing into the kernel layout
# ----------------------------------------------------------------------------
def _pack_fft_stack(blocks, nheads, H):
    """Stack per-block params over a leading nblocks axis (streamed in-kernel).

    QKV columns are permuted from the reference interleaved layout
    [Q0 K0 V0 | Q1 K1 V1 | ...] to contiguous slabs [Q_all | K_all | V_all],
    with 1/sqrt(d_head) folded into the Q columns + bias
    (softmax(QK^T/s) == softmax((Q/s)K^T)).  Matmul weights are bf16.
    """
    dh = H // nheads
    inv_scale = 1.0 / math.sqrt(H / nheads)
    perm = np.concatenate([np.arange(dh) + h * 3 * dh + part * dh
                           for part in range(3) for h in range(nheads)])
    scale = np.ones((3 * H,), np.float32)
    scale[:H] = inv_scale
    perm = jnp.asarray(perm)
    scale = jnp.asarray(scale)

    def kqv_w(b):
        return (b["wkqv"][:, perm] * scale[None, :]).astype(jnp.bfloat16)

    def kqv_b(b):
        return (b["bkqv"][perm] * scale)[None, :]

    st = lambda xs: jnp.stack(xs, axis=0)
    row = lambda key: st([b[key] for b in blocks])[:, None, :]
    return dict(
        wkqv=st([kqv_w(b) for b in blocks]),                      # (nb, H, 3H) bf16
        bkqv=st([kqv_b(b) for b in blocks]),                      # (nb, 1, 3H) f32
        wproj=st([b["wproj"] for b in blocks]).astype(jnp.bfloat16),
        bproj=row("bproj"), ag=row("ag"), ab=row("ab"),
        wc1=st([b["wc1"] for b in blocks]).astype(jnp.bfloat16),  # (nb, ks, H, nf)
        bc1=row("bc1"),
        wc2=st([b["wc2"] for b in blocks]).astype(jnp.bfloat16),  # (nb, ks, nf, H)
        bc2=row("bc2"), cg=row("cg"), cb=row("cb"))


def _pack_durpred(p):
    row = lambda v: v[None, :]
    wl = jnp.zeros((p["wl"].shape[0], DUR_PAD), jnp.float32).at[:, :1].set(p["wl"])
    bl = jnp.zeros((1, DUR_PAD), jnp.float32).at[:, :1].set(p["bl"][None, :])
    return dict(
        w1=p["w1"].astype(jnp.bfloat16), b1=row(p["b1"]),
        g1=row(p["g1"]), be1=row(p["be1"]),
        w2=p["w2"].astype(jnp.bfloat16), b2=row(p["b2"]),
        g2=row(p["g2"]), be2=row(p["be2"]),
        wl=wl.astype(jnp.bfloat16), bl=bl)


def _pack_linear(w, b):
    H, nout = w.shape
    nout_pad = -(-nout // LANE) * LANE            # lane-dense final store
    wp = jnp.zeros((H, nout_pad), jnp.float32).at[:, :nout].set(w)
    bp = jnp.zeros((1, nout_pad), jnp.float32).at[:, :nout].set(b[None, :])
    return dict(w=wp.astype(jnp.bfloat16), b=bp, nout=nout)


def init_params(key, vocab_sz, H, nout, nheads, ks, nf, nblocks, ks_v, nf_v):
    assert H % nheads == 0
    assert ks % 2 == 1 and ks_v % 2 == 1, "symmetric 'same' padding assumed"
    keys = iter(jax.random.split(key, 256))

    def nrm(shape, scale=0.1):
        return scale * jax.random.normal(next(keys), shape, dtype=jnp.float32)

    def fft_block():
        # Linear weights stored (in, out); Conv1d weights stored (ks, Cin, Cout)
        # (transposed from PyTorch's (Cout, Cin, ks)).  kqv columns follow the
        # reference head-chunk layout [Q_0|K_0|V_0 | Q_1|K_1|V_1 | ...].
        return dict(
            wkqv=nrm((H, 3 * H)), bkqv=nrm((3 * H,)),
            wproj=nrm((H, H)), bproj=nrm((H,)),
            ag=jnp.ones((H,), jnp.float32), ab=jnp.zeros((H,), jnp.float32),
            wc1=nrm((ks, H, nf)), bc1=nrm((nf,)),
            wc2=nrm((ks, nf, H)), bc2=nrm((H,)),
            cg=jnp.ones((H,), jnp.float32), cb=jnp.zeros((H,), jnp.float32))

    fft_pho = [fft_block() for _ in range(nblocks)]
    fft_mel = [fft_block() for _ in range(nblocks)]
    durpred = dict(
        w1=nrm((ks_v, H, nf_v)), b1=nrm((nf_v,)),
        g1=jnp.ones((nf_v,), jnp.float32), be1=jnp.zeros((nf_v,), jnp.float32),
        w2=nrm((ks_v, nf_v, H)), b2=nrm((H,)),
        g2=jnp.ones((H,), jnp.float32), be2=jnp.zeros((H,), jnp.float32),
        wl=nrm((H, 1)), bl=nrm((1,)))

    return dict(
        cfg=dict(nblocks=nblocks, nheads=nheads, ks=ks, ks_v=ks_v),
        emb=nrm((vocab_sz, H), 1.0),
        fft_pho=_pack_fft_stack(fft_pho, nheads, H),
        durpred=_pack_durpred(durpred),
        fft_mel=_pack_fft_stack(fft_mel, nheads, H),
        linear=_pack_linear(nrm((H, nout)), nrm((nout,))))


# ----------------------------------------------------------------------------
if __name__ == "__main__":
    vocab_sz, nhidden, nout = 20, 32, 16
    nheads, kernal_sz, nfilters, nblocks = 2, 3, 48, 2
    kernal_sz_v, nfilters_v = 3, 24
    B, S = 2, 8

    key = jax.random.PRNGKey(0)
    pkey, tkey = jax.random.split(key)
    params = init_params(pkey, vocab_sz, nhidden, nout, nheads,
                         kernal_sz, nfilters, nblocks, kernal_sz_v, nfilters_v)

    tokens = jax.random.randint(tkey, (B, S), 0, vocab_sz)
    durations = np.array([[2, 1, 3, 1, 2, 1, 2, 4],
                          [1, 2, 2, 3, 1, 3, 2, 2]], dtype=np.int32)  # both sum to 16

    mel, log_dur = fastspeech_forward(params, tokens, durations,
                                      upsample_ratio=1.0, dur_train=True)
    jax.block_until_ready((mel, log_dur))

    T = int(durations[0].sum())
    assert mel.shape == (B, nout, T), mel.shape
    assert log_dur.shape == (B, S), log_dur.shape
    assert bool(jnp.all(jnp.isfinite(mel))) and bool(jnp.all(jnp.isfinite(log_dur)))
    print("KERNEL_OK")
</pallas_src>

<mosaic_0001>
module attributes {stable_mosaic.version = 11 : i64} {
  func.func @_pho_stack_kernel(%arg0: i32, %arg1: i32, %arg2: memref<2x8x32xf32, #tpu.memory_space<vmem>>, %arg3: memref<8x32xf32, #tpu.memory_space<vmem>>, %arg4: memref<1x32x96xbf16, #tpu.memory_space<vmem>>, %arg5: memref<1x1x96xf32, #tpu.memory_space<vmem>>, %arg6: memref<1x32x32xbf16, #tpu.memory_space<vmem>>, %arg7: memref<1x1x32xf32, #tpu.memory_space<vmem>>, %arg8: memref<1x1x32xf32, #tpu.memory_space<vmem>>, %arg9: memref<1x1x32xf32, #tpu.memory_space<vmem>>, %arg10: memref<1x3x32x48xbf16, #tpu.memory_space<vmem>>, %arg11: memref<1x1x48xf32, #tpu.memory_space<vmem>>, %arg12: memref<1x3x48x32xbf16, #tpu.memory_space<vmem>>, %arg13: memref<1x1x32xf32, #tpu.memory_space<vmem>>, %arg14: memref<1x1x32xf32, #tpu.memory_space<vmem>>, %arg15: memref<1x1x32xf32, #tpu.memory_space<vmem>>, %arg16: memref<3x32x24xbf16, #tpu.memory_space<vmem>>, %arg17: memref<1x24xf32, #tpu.memory_space<vmem>>, %arg18: memref<1x24xf32, #tpu.memory_space<vmem>>, %arg19: memref<1x24xf32, #tpu.memory_space<vmem>>, %arg20: memref<3x24x32xbf16, #tpu.memory_space<vmem>>, %arg21: memref<1x32xf32, #tpu.memory_space<vmem>>, %arg22: memref<1x32xf32, #tpu.memory_space<vmem>>, %arg23: memref<1x32xf32, #tpu.memory_space<vmem>>, %arg24: memref<32x128xbf16, #tpu.memory_space<vmem>>, %arg25: memref<1x128xf32, #tpu.memory_space<vmem>>, %arg26: memref<2x8x32xf32, #tpu.memory_space<vmem>>, %arg27: memref<2x8x128xf32, #tpu.memory_space<vmem>>, %arg28: memref<16x32xf32, #tpu.memory_space<vmem>>) attributes {dimension_semantics = [#tpu.dimension_semantics<parallel>, #tpu.dimension_semantics<arbitrary>], iteration_bounds = array<i64: 1, 2>, scalar_prefetch = 0 : i64, scratch_operands = 1 : i64, tpu.core_type = #tpu.core_type<tc>, window_params = [{transform_indices = @transform_0, window_bounds = array<i64: 2, 8, 32>}, {pipeline_mode = #tpu.pipeline_mode<synchronous>, transform_indices = @transform_1, window_bounds = array<i64: 8, 32>}, {transform_indices = @transform_2, window_bounds = array<i64: 1, 32, 96>}, {transform_indices = @transform_3, window_bounds = array<i64: 1, 1, 96>}, {transform_indices = @transform_4, window_bounds = array<i64: 1, 32, 32>}, {transform_indices = @transform_5, window_bounds = array<i64: 1, 1, 32>}, {transform_indices = @transform_6, window_bounds = array<i64: 1, 1, 32>}, {transform_indices = @transform_7, window_bounds = array<i64: 1, 1, 32>}, {transform_indices = @transform_8, window_bounds = array<i64: 1, 3, 32, 48>}, {transform_indices = @transform_9, window_bounds = array<i64: 1, 1, 48>}, {transform_indices = @transform_10, window_bounds = array<i64: 1, 3, 48, 32>}, {transform_indices = @transform_11, window_bounds = array<i64: 1, 1, 32>}, {transform_indices = @transform_12, window_bounds = array<i64: 1, 1, 32>}, {transform_indices = @transform_13, window_bounds = array<i64: 1, 1, 32>}, {pipeline_mode = #tpu.pipeline_mode<synchronous>, transform_indices = @transform_14, window_bounds = array<i64: 3, 32, 24>}, {pipeline_mode = #tpu.pipeline_mode<synchronous>, transform_indices = @transform_15, window_bounds = array<i64: 1, 24>}, {pipeline_mode = #tpu.pipeline_mode<synchronous>, transform_indices = @transform_16, window_bounds = array<i64: 1, 24>}, {pipeline_mode = #tpu.pipeline_mode<synchronous>, transform_indices = @transform_17, window_bounds = array<i64: 1, 24>}, {pipeline_mode = #tpu.pipeline_mode<synchronous>, transform_indices = @transform_18, window_bounds = array<i64: 3, 24, 32>}, {pipeline_mode = #tpu.pipeline_mode<synchronous>, transform_indices = @transform_19, window_bounds = array<i64: 1, 32>}, {pipeline_mode = #tpu.pipeline_mode<synchronous>, transform_indices = @transform_20, window_bounds = array<i64: 1, 32>}, {pipeline_mode = #tpu.pipeline_mode<synchronous>, transform_indices = @transform_21, window_bounds = array<i64: 1, 32>}, {pipeline_mode = #tpu.pipeline_mode<synchronous>, transform_indices = @transform_22, window_bounds = array<i64: 32, 128>}, {pipeline_mode = #tpu.pipeline_mode<synchronous>, transform_indices = @transform_23, window_bounds = array<i64: 1, 128>}, {transform_indices = @transform_24, window_bounds = array<i64: 2, 8, 32>}, {transform_indices = @transform_25, window_bounds = array<i64: 2, 8, 128>}]} {
    %c0_i32 = arith.constant 0 : i32
    %0 = arith.cmpi eq, %arg1, %c0_i32 : i32
    %1 = arith.extui %0 : i1 to i32
    %c0_i32_0 = arith.constant 0 : i32
    %2 = arith.cmpi ne, %1, %c0_i32_0 : i32
    scf.if %2 {
      %c0_130 = arith.constant 0 : index
      %c0_131 = arith.constant 0 : index
      %c0_132 = arith.constant 0 : index
      %301 = vector.load %arg2[%c0_130, %c0_131, %c0_132] : memref<2x8x32xf32, #tpu.memory_space<vmem>>, vector<2x8x32xf32>
      %c0_133 = arith.constant 0 : index
      %c0_134 = arith.constant 0 : index
      %302 = vector.load %arg3[%c0_133, %c0_134] : memref<8x32xf32, #tpu.memory_space<vmem>>, vector<8x32xf32>
      %303 = vector.shape_cast %302 : vector<8x32xf32> to vector<1x8x32xf32>
      %304 = vector.broadcast %303 : vector<1x8x32xf32> to vector<2x8x32xf32>
      %305 = arith.addf %301, %304 : vector<2x8x32xf32>
      %306 = vector.shape_cast %305 : vector<2x8x32xf32> to vector<16x32xf32>
      %c0_135 = arith.constant 0 : index
      %c0_136 = arith.constant 0 : index
      %307 = vector.load %arg28[%c0_135, %c0_136] : memref<16x32xf32, #tpu.memory_space<vmem>>, vector<16x32xf32>
      tpu.vector_store %arg28[%c0_135, %c0_136], %306 {strides = array<i32>} : memref<16x32xf32, #tpu.memory_space<vmem>>, vector<16x32xf32>,
    } else {
    }
    %c0 = arith.constant 0 : index
    %c0_1 = arith.constant 0 : index
    %3 = vector.load %arg28[%c0, %c0_1] : memref<16x32xf32, #tpu.memory_space<vmem>>, vector<16x32xf32>
    %c0_2 = arith.constant 0 : index
    %c0_3 = arith.constant 0 : index
    %c0_4 = arith.constant 0 : index
    %4 = vector.load %arg4[%c0_2, %c0_3, %c0_4] : memref<1x32x96xbf16, #tpu.memory_space<vmem>>, vector<1x32x96xbf16>
    %5 = vector.shape_cast %4 : vector<1x32x96xbf16> to vector<32x96xbf16>
    %c0_5 = arith.constant 0 : index
    %c0_6 = arith.constant 0 : index
    %c0_7 = arith.constant 0 : index
    %6 = vector.load %arg5[%c0_5, %c0_6, %c0_7] : memref<1x1x96xf32, #tpu.memory_space<vmem>>, vector<1x1x96xf32>
    %7 = vector.shape_cast %6 : vector<1x1x96xf32> to vector<1x96xf32>
    %c0_8 = arith.constant 0 : index
    %c0_9 = arith.constant 0 : index
    %c0_10 = arith.constant 0 : index
    %8 = vector.load %arg6[%c0_8, %c0_9, %c0_10] : memref<1x32x32xbf16, #tpu.memory_space<vmem>>, vector<1x32x32xbf16>
    %9 = vector.shape_cast %8 : vector<1x32x32xbf16> to vector<32x32xbf16>
    %c0_11 = arith.constant 0 : index
    %c0_12 = arith.constant 0 : index
    %c0_13 = arith.constant 0 : index
    %10 = vector.load %arg7[%c0_11, %c0_12, %c0_13] : memref<1x1x32xf32, #tpu.memory_space<vmem>>, vector<1x1x32xf32>
    %11 = vector.shape_cast %10 : vector<1x1x32xf32> to vector<1x32xf32>
    %c0_14 = arith.constant 0 : index
    %c0_15 = arith.constant 0 : index
    %c0_16 = arith.constant 0 : index
    %12 = vector.load %arg8[%c0_14, %c0_15, %c0_16] : memref<1x1x32xf32, #tpu.memory_space<vmem>>, vector<1x1x32xf32>
    %13 = vector.shape_cast %12 : vector<1x1x32xf32> to vector<1x32xf32>
    %c0_17 = arith.constant 0 : index
    %c0_18 = arith.constant 0 : index
    %c0_19 = arith.constant 0 : index
    %14 = vector.load %arg9[%c0_17, %c0_18, %c0_19] : memref<1x1x32xf32, #tpu.memory_space<vmem>>, vector<1x1x32xf32>
    %15 = vector.shape_cast %14 : vector<1x1x32xf32> to vector<1x32xf32>
    %c0_20 = arith.constant 0 : index
    %c0_21 = arith.constant 0 : index
    %c0_22 = arith.constant 0 : index
    %c0_23 = arith.constant 0 : index
    %16 = vector.load %arg10[%c0_20, %c0_21, %c0_22, %c0_23] : memref<1x3x32x48xbf16, #tpu.memory_space<vmem>>, vector<1x1x32x48xbf16>
    %17 = vector.shape_cast %16 : vector<1x1x32x48xbf16> to vector<32x48xbf16>
    %c0_24 = arith.constant 0 : index
    %c1 = arith.constant 1 : index
    %c0_25 = arith.constant 0 : index
    %c0_26 = arith.constant 0 : index
    %18 = vector.load %arg10[%c0_24, %c1, %c0_25, %c0_26] : memref<1x3x32x48xbf16, #tpu.memory_space<vmem>>, vector<1x1x32x48xbf16>
    %19 = vector.shape_cast %18 : vector<1x1x32x48xbf16> to vector<32x48xbf16>
    %c0_27 = arith.constant 0 : index
    %c2 = arith.constant 2 : index
    %c0_28 = arith.constant 0 : index
    %c0_29 = arith.constant 0 : index
    %20 = vector.load %arg10[%c0_27, %c2, %c0_28, %c0_29] : memref<1x3x32x48xbf16, #tpu.memory_space<vmem>>, vector<1x1x32x48xbf16>
    %21 = vector.shape_cast %20 : vector<1x1x32x48xbf16> to vector<32x48xbf16>
    %c0_30 = arith.constant 0 : index
    %c0_31 = arith.constant 0 : index
    %c0_32 = arith.constant 0 : index
    %22 = vector.load %arg11[%c0_30, %c0_31, %c0_32] : memref<1x1x48xf32, #tpu.memory_space<vmem>>, vector<1x1x48xf32>
    %23 = vector.shape_cast %22 : vector<1x1x48xf32> to vector<1x48xf32>
    %c0_33 = arith.constant 0 : index
    %c0_34 = arith.constant 0 : index
    %c0_35 = arith.constant 0 : index
    %c0_36 = arith.constant 0 : index
    %24 = vector.load %arg12[%c0_33, %c0_34, %c0_35, %c0_36] : memref<1x3x48x32xbf16, #tpu.memory_space<vmem>>, vector<1x1x48x32xbf16>
    %25 = vector.shape_cast %24 : vector<1x1x48x32xbf16> to vector<48x32xbf16>
    %c0_37 = arith.constant 0 : index
    %c1_38 = arith.constant 1 : index
    %c0_39 = arith.constant 0 : index
    %c0_40 = arith.constant 0 : index
    %26 = vector.load %arg12[%c0_37, %c1_38, %c0_39, %c0_40] : memref<1x3x48x32xbf16, #tpu.memory_space<vmem>>, vector<1x1x48x32xbf16>
    %27 = vector.shape_cast %26 : vector<1x1x48x32xbf16> to vector<48x32xbf16>
    %c0_41 = arith.constant 0 : index
    %c2_42 = arith.constant 2 : index
    %c0_43 = arith.constant 0 : index
    %c0_44 = arith.constant 0 : index
    %28 = vector.load %arg12[%c0_41, %c2_42, %c0_43, %c0_44] : memref<1x3x48x32xbf16, #tpu.memory_space<vmem>>, vector<1x1x48x32xbf16>
    %29 = vector.shape_cast %28 : vector<1x1x48x32xbf16> to vector<48x32xbf16>
    %c0_45 = arith.constant 0 : index
    %c0_46 = arith.constant 0 : index
    %c0_47 = arith.constant 0 : index
    %30 = vector.load %arg13[%c0_45, %c0_46, %c0_47] : memref<1x1x32xf32, #tpu.memory_space<vmem>>, vector<1x1x32xf32>
    %31 = vector.shape_cast %30 : vector<1x1x32xf32> to vector<1x32xf32>
    %c0_48 = arith.constant 0 : index
    %c0_49 = arith.constant 0 : index
    %c0_50 = arith.constant 0 : index
    %32 = vector.load %arg14[%c0_48, %c0_49, %c0_50] : memref<1x1x32xf32, #tpu.memory_space<vmem>>, vector<1x1x32xf32>
    %33 = vector.shape_cast %32 : vector<1x1x32xf32> to vector<1x32xf32>
    %c0_51 = arith.constant 0 : index
    %c0_52 = arith.constant 0 : index
    %c0_53 = arith.constant 0 : index
    %34 = vector.load %arg15[%c0_51, %c0_52, %c0_53] : memref<1x1x32xf32, #tpu.memory_space<vmem>>, vector<1x1x32xf32>
    %35 = vector.shape_cast %34 : vector<1x1x32xf32> to vector<1x32xf32>
    %36 = arith.truncf %3 : vector<16x32xf32> to vector<16x32xbf16>
    %cst = arith.constant dense<0.000000e+00> : vector<16x96xf32>
    %37 = tpu.matmul %36, %5, %cst {dimension_numbers = #tpu.dot_dimension_numbers<[1], [0], [0], [1], [0, 0, 1, 1], [], []>} : vector<16x32xbf16>, vector<32x96xbf16>, vector<16x96xf32> -> vector<16x96xf32>
    %38 = vector.broadcast %7 : vector<1x96xf32> to vector<16x96xf32>
    %39 = arith.addf %37, %38 : vector<16x96xf32>
    %40 = vector.extract_strided_slice %39 {offsets = [0, 0], sizes = [8, 16], strides = [1, 1]} : vector<16x96xf32> to vector<8x16xf32>
    %41 = vector.extract_strided_slice %39 {offsets = [0, 32], sizes = [8, 16], strides = [1, 1]} : vector<16x96xf32> to vector<8x16xf32>
    %42 = vector.extract_strided_slice %39 {offsets = [0, 64], sizes = [8, 16], strides = [1, 1]} : vector<16x96xf32> to vector<8x16xf32>
    %43 = arith.truncf %40 : vector<8x16xf32> to vector<8x16xbf16>
    %44 = arith.truncf %41 : vector<8x16xf32> to vector<8x16xbf16>
    %cst_54 = arith.constant dense<0.000000e+00> : vector<8x8xf32>
    %45 = tpu.matmul %43, %44, %cst_54 {dimension_numbers = #tpu.dot_dimension_numbers<[1], [1], [0], [0], [0, 0, 1, 0], [], []>} : vector<8x16xbf16>, vector<8x16xbf16>, vector<8x8xf32> -> vector<8x8xf32>
    %cst_55 = arith.constant dense<0xFF800000> : vector<8xf32>
    %46 = vector.multi_reduction <maximumf>, %45, %cst_55 [1] : vector<8x8xf32> to vector<8xf32>
    %47 = vector.shape_cast %46 : vector<8xf32> to vector<8x1xf32>
    %48 = vector.broadcast %47 : vector<8x1xf32> to vector<8x8xf32>
    %49 = arith.subf %45, %48 : vector<8x8xf32>
    %50 = math.exp %49 : vector<8x8xf32>
    %cst_56 = arith.constant dense<0.000000e+00> : vector<8xf32>
    %51 = vector.multi_reduction <add>, %50, %cst_56 [1] : vector<8x8xf32> to vector<8xf32>
    %52 = vector.shape_cast %51 : vector<8xf32> to vector<8x1xf32>
    %53 = tpu.reciprocal %52 {approx = true} : vector<8x1xf32> -> vector<8x1xf32>
    %54 = vector.broadcast %53 : vector<8x1xf32> to vector<8x8xf32>
    %55 = arith.mulf %50, %54 : vector<8x8xf32>
    %56 = arith.truncf %55 : vector<8x8xf32> to vector<8x8xbf16>
    %57 = arith.truncf %42 : vector<8x16xf32> to vector<8x16xbf16>
    %cst_57 = arith.constant dense<0.000000e+00> : vector<8x16xf32>
    %58 = tpu.matmul %56, %57, %cst_57 {dimension_numbers = #tpu.dot_dimension_numbers<[1], [0], [0], [1], [0, 0, 1, 1], [], []>} : vector<8x8xbf16>, vector<8x16xbf16>, vector<8x16xf32> -> vector<8x16xf32>
    %59 = vector.extract_strided_slice %9 {offsets = [0, 0], sizes = [16, 32], strides = [1, 1]} : vector<32x32xbf16> to vector<16x32xbf16>
    %60 = arith.truncf %58 : vector<8x16xf32> to vector<8x16xbf16>
    %cst_58 = arith.constant dense<0.000000e+00> : vector<8x32xf32>
    %61 = tpu.matmul %60, %59, %cst_58 {dimension_numbers = #tpu.dot_dimension_numbers<[1], [0], [0], [1], [0, 0, 1, 1], [], []>} : vector<8x16xbf16>, vector<16x32xbf16>, vector<8x32xf32> -> vector<8x32xf32>
    %62 = vector.extract_strided_slice %39 {offsets = [0, 16], sizes = [8, 16], strides = [1, 1]} : vector<16x96xf32> to vector<8x16xf32>
    %63 = vector.extract_strided_slice %39 {offsets = [0, 48], sizes = [8, 16], strides = [1, 1]} : vector<16x96xf32> to vector<8x16xf32>
    %64 = vector.extract_strided_slice %39 {offsets = [0, 80], sizes = [8, 16], strides = [1, 1]} : vector<16x96xf32> to vector<8x16xf32>
    %65 = arith.truncf %62 : vector<8x16xf32> to vector<8x16xbf16>
    %66 = arith.truncf %63 : vector<8x16xf32> to vector<8x16xbf16>
    %cst_59 = arith.constant dense<0.000000e+00> : vector<8x8xf32>
    %67 = tpu.matmul %65, %66, %cst_59 {dimension_numbers = #tpu.dot_dimension_numbers<[1], [1], [0], [0], [0, 0, 1, 0], [], []>} : vector<8x16xbf16>, vector<8x16xbf16>, vector<8x8xf32> -> vector<8x8xf32>
    %cst_60 = arith.constant dense<0xFF800000> : vector<8xf32>
    %68 = vector.multi_reduction <maximumf>, %67, %cst_60 [1] : vector<8x8xf32> to vector<8xf32>
    %69 = vector.shape_cast %68 : vector<8xf32> to vector<8x1xf32>
    %70 = vector.broadcast %69 : vector<8x1xf32> to vector<8x8xf32>
    %71 = arith.subf %67, %70 : vector<8x8xf32>
    %72 = math.exp %71 : vector<8x8xf32>
    %cst_61 = arith.constant dense<0.000000e+00> : vector<8xf32>
    %73 = vector.multi_reduction <add>, %72, %cst_61 [1] : vector<8x8xf32> to vector<8xf32>
    %74 = vector.shape_cast %73 : vector<8xf32> to vector<8x1xf32>
    %75 = tpu.reciprocal %74 {approx = true} : vector<8x1xf32> -> vector<8x1xf32>
    %76 = vector.broadcast %75 : vector<8x1xf32> to vector<8x8xf32>
    %77 = arith.mulf %72, %76 : vector<8x8xf32>
    %78 = arith.truncf %77 : vector<8x8xf32> to vector<8x8xbf16>
    %79 = arith.truncf %64 : vector<8x16xf32> to vector<8x16xbf16>
    %cst_62 = arith.constant dense<0.000000e+00> : vector<8x16xf32>
    %80 = tpu.matmul %78, %79, %cst_62 {dimension_numbers = #tpu.dot_dimension_numbers<[1], [0], [0], [1], [0, 0, 1, 1], [], []>} : vector<8x8xbf16>, vector<8x16xbf16>, vector<8x16xf32> -> vector<8x16xf32>
    %81 = vector.extract_strided_slice %9 {offsets = [16, 0], sizes = [16, 32], strides = [1, 1]} : vector<32x32xbf16> to vector<16x32xbf16>
    %82 = arith.truncf %80 : vector<8x16xf32> to vector<8x16xbf16>
    %cst_63 = arith.constant dense<0.000000e+00> : vector<8x32xf32>
    %83 = tpu.matmul %82, %81, %cst_63 {dimension_numbers = #tpu.dot_dimension_numbers<[1], [0], [0], [1], [0, 0, 1, 1], [], []>} : vector<8x16xbf16>, vector<16x32xbf16>, vector<8x32xf32> -> vector<8x32xf32>
    %84 = arith.addf %61, %83 : vector<8x32xf32>
    %85 = vector.extract_strided_slice %39 {offsets = [8, 0], sizes = [8, 16], strides = [1, 1]} : vector<16x96xf32> to vector<8x16xf32>
    %86 = vector.extract_strided_slice %39 {offsets = [8, 32], sizes = [8, 16], strides = [1, 1]} : vector<16x96xf32> to vector<8x16xf32>
    %87 = vector.extract_strided_slice %39 {offsets = [8, 64], sizes = [8, 16], strides = [1, 1]} : vector<16x96xf32> to vector<8x16xf32>
    %88 = arith.truncf %85 : vector<8x16xf32> to vector<8x16xbf16>
    %89 = arith.truncf %86 : vector<8x16xf32> to vector<8x16xbf16>
    %cst_64 = arith.constant dense<0.000000e+00> : vector<8x8xf32>
    %90 = tpu.matmul %88, %89, %cst_64 {dimension_numbers = #tpu.dot_dimension_numbers<[1], [1], [0], [0], [0, 0, 1, 0], [], []>} : vector<8x16xbf16>, vector<8x16xbf16>, vector<8x8xf32> -> vector<8x8xf32>
    %cst_65 = arith.constant dense<0xFF800000> : vector<8xf32>
    %91 = vector.multi_reduction <maximumf>, %90, %cst_65 [1] : vector<8x8xf32> to vector<8xf32>
    %92 = vector.shape_cast %91 : vector<8xf32> to vector<8x1xf32>
    %93 = vector.broadcast %92 : vector<8x1xf32> to vector<8x8xf32>
    %94 = arith.subf %90, %93 : vector<8x8xf32>
    %95 = math.exp %94 : vector<8x8xf32>
    %cst_66 = arith.constant dense<0.000000e+00> : vector<8xf32>
    %96 = vector.multi_reduction <add>, %95, %cst_66 [1] : vector<8x8xf32> to vector<8xf32>
    %97 = vector.shape_cast %96 : vector<8xf32> to vector<8x1xf32>
    %98 = tpu.reciprocal %97 {approx = true} : vector<8x1xf32> -> vector<8x1xf32>
    %99 = vector.broadcast %98 : vector<8x1xf32> to vector<8x8xf32>
    %100 = arith.mulf %95, %99 : vector<8x8xf32>
    %101 = arith.truncf %100 : vector<8x8xf32> to vector<8x8xbf16>
    %102 = arith.truncf %87 : vector<8x16xf32> to vector<8x16xbf16>
    %cst_67 = arith.constant dense<0.000000e+00> : vector<8x16xf32>
    %103 = tpu.matmul %101, %102, %cst_67 {dimension_numbers = #tpu.dot_dimension_numbers<[1], [0], [0], [1], [0, 0, 1, 1], [], []>} : vector<8x8xbf16>, vector<8x16xbf16>, vector<8x16xf32> -> vector<8x16xf32>
    %104 = vector.extract_strided_slice %9 {offsets = [0, 0], sizes = [16, 32], strides = [1, 1]} : vector<32x32xbf16> to vector<16x32xbf16>
    %105 = arith.truncf %103 : vector<8x16xf32> to vector<8x16xbf16>
    %cst_68 = arith.constant dense<0.000000e+00> : vector<8x32xf32>
    %106 = tpu.matmul %105, %104, %cst_68 {dimension_numbers = #tpu.dot_dimension_numbers<[1], [0], [0], [1], [0, 0, 1, 1], [], []>} : vector<8x16xbf16>, vector<16x32xbf16>, vector<8x32xf32> -> vector<8x32xf32>
    %107 = vector.extract_strided_slice %39 {offsets = [8, 16], sizes = [8, 16], strides = [1, 1]} : vector<16x96xf32> to vector<8x16xf32>
    %108 = vector.extract_strided_slice %39 {offsets = [8, 48], sizes = [8, 16], strides = [1, 1]} : vector<16x96xf32> to vector<8x16xf32>
    %109 = vector.extract_strided_slice %39 {offsets = [8, 80], sizes = [8, 16], strides = [1, 1]} : vector<16x96xf32> to vector<8x16xf32>
    %110 = arith.truncf %107 : vector<8x16xf32> to vector<8x16xbf16>
    %111 = arith.truncf %108 : vector<8x16xf32> to vector<8x16xbf16>
    %cst_69 = arith.constant dense<0.000000e+00> : vector<8x8xf32>
    %112 = tpu.matmul %110, %111, %cst_69 {dimension_numbers = #tpu.dot_dimension_numbers<[1], [1], [0], [0], [0, 0, 1, 0], [], []>} : vector<8x16xbf16>, vector<8x16xbf16>, vector<8x8xf32> -> vector<8x8xf32>
    %cst_70 = arith.constant dense<0xFF800000> : vector<8xf32>
    %113 = vector.multi_reduction <maximumf>, %112, %cst_70 [1] : vector<8x8xf32> to vector<8xf32>
    %114 = vector.shape_cast %113 : vector<8xf32> to vector<8x1xf32>
    %115 = vector.broadcast %114 : vector<8x1xf32> to vector<8x8xf32>
    %116 = arith.subf %112, %115 : vector<8x8xf32>
    %117 = math.exp %116 : vector<8x8xf32>
    %cst_71 = arith.constant dense<0.000000e+00> : vector<8xf32>
    %118 = vector.multi_reduction <add>, %117, %cst_71 [1] : vector<8x8xf32> to vector<8xf32>
    %119 = vector.shape_cast %118 : vector<8xf32> to vector<8x1xf32>
    %120 = tpu.reciprocal %119 {approx = true} : vector<8x1xf32> -> vector<8x1xf32>
    %121 = vector.broadcast %120 : vector<8x1xf32> to vector<8x8xf32>
    %122 = arith.mulf %117, %121 : vector<8x8xf32>
    %123 = arith.truncf %122 : vector<8x8xf32> to vector<8x8xbf16>
    %124 = arith.truncf %109 : vector<8x16xf32> to vector<8x16xbf16>
    %cst_72 = arith.constant dense<0.000000e+00> : vector<8x16xf32>
    %125 = tpu.matmul %123, %124, %cst_72 {dimension_numbers = #tpu.dot_dimension_numbers<[1], [0], [0], [1], [0, 0, 1, 1], [], []>} : vector<8x8xbf16>, vector<8x16xbf16>, vector<8x16xf32> -> vector<8x16xf32>
    %126 = vector.extract_strided_slice %9 {offsets = [16, 0], sizes = [16, 32], strides = [1, 1]} : vector<32x32xbf16> to vector<16x32xbf16>
    %127 = arith.truncf %125 : vector<8x16xf32> to vector<8x16xbf16>
    %cst_73 = arith.constant dense<0.000000e+00> : vector<8x32xf32>
    %128 = tpu.matmul %127, %126, %cst_73 {dimension_numbers = #tpu.dot_dimension_numbers<[1], [0], [0], [1], [0, 0, 1, 1], [], []>} : vector<8x16xbf16>, vector<16x32xbf16>, vector<8x32xf32> -> vector<8x32xf32>
    %129 = arith.addf %106, %128 : vector<8x32xf32>
    %130 = tpu.concatenate %84, %129 in 0 : vector<8x32xf32>, vector<8x32xf32> -> vector<16x32xf32>
    %131 = vector.broadcast %11 : vector<1x32xf32> to vector<16x32xf32>
    %132 = arith.addf %130, %131 : vector<16x32xf32>
    %133 = arith.addf %132, %3 : vector<16x32xf32>
    %cst_74 = arith.constant dense<0.000000e+00> : vector<16xf32>
    %134 = vector.multi_reduction <add>, %133, %cst_74 [1] : vector<16x32xf32> to vector<16xf32>
    %135 = vector.shape_cast %134 : vector<16xf32> to vector<16x1xf32>
    %cst_75 = arith.constant 3.200000e+01 : f32
    %136 = vector.broadcast %cst_75 : f32 to vector<16x1xf32>
    %137 = arith.divf %135, %136 : vector<16x1xf32>
    %138 = arith.mulf %133, %133 : vector<16x32xf32>
    %cst_76 = arith.constant dense<0.000000e+00> : vector<16xf32>
    %139 = vector.multi_reduction <add>, %138, %cst_76 [1] : vector<16x32xf32> to vector<16xf32>
    %140 = vector.shape_cast %139 : vector<16xf32> to vector<16x1xf32>
    %cst_77 = arith.constant 3.200000e+01 : f32
    %141 = vector.broadcast %cst_77 : f32 to vector<16x1xf32>
    %142 = arith.divf %140, %141 : vector<16x1xf32>
    %143 = arith.mulf %137, %137 : vector<16x1xf32>
    %144 = arith.subf %142, %143 : vector<16x1xf32>
    %cst_78 = arith.constant 0.000000e+00 : f32
    %145 = vector.broadcast %cst_78 : f32 to vector<16x1xf32>
    %146 = arith.maximumf %144, %145 : vector<16x1xf32>
    %147 = vector.broadcast %137 : vector<16x1xf32> to vector<16x32xf32>
    %148 = arith.subf %133, %147 : vector<16x32xf32>
    %cst_79 = arith.constant 9.99999974E-6 : f32
    %149 = vector.broadcast %cst_79 : f32 to vector<16x1xf32>
    %150 = arith.addf %146, %149 : vector<16x1xf32>
    %151 = math.rsqrt %150 : vector<16x1xf32>
    %152 = vector.broadcast %151 : vector<16x1xf32> to vector<16x32xf32>
    %153 = arith.mulf %148, %152 : vector<16x32xf32>
    %154 = vector.broadcast %13 : vector<1x32xf32> to vector<16x32xf32>
    %155 = arith.mulf %153, %154 : vector<16x32xf32>
    %156 = vector.broadcast %15 : vector<1x32xf32> to vector<16x32xf32>
    %157 = arith.addf %155, %156 : vector<16x32xf32>
    %158 = arith.truncf %157 : vector<16x32xf32> to vector<16x32xbf16>
    %cst_80 = arith.constant dense<0.000000e+00> : vector<16x48xf32>
    %159 = tpu.matmul %158, %19, %cst_80 {dimension_numbers = #tpu.dot_dimension_numbers<[1], [0], [0], [1], [0, 0, 1, 1], [], []>} : vector<16x32xbf16>, vector<32x48xbf16>, vector<16x48xf32> -> vector<16x48xf32>
    %160 = vector.broadcast %23 : vector<1x48xf32> to vector<16x48xf32>
    %161 = arith.addf %159, %160 : vector<16x48xf32>
    %162 = tpu.iota {dimensions = array<i32: 0>} : vector<16x1xi32>
    %c8_i32 = arith.constant 8 : i32
    %c0_i32_81 = arith.constant 0 : i32
    %163 = arith.cmpi eq, %c8_i32, %c0_i32_81 : i32
    %c1_i32 = arith.constant 1 : i32
    %164 = arith.select %163, %c1_i32, %c8_i32 : i32
    %165 = vector.broadcast %164 : i32 to vector<16x1xi32>
    %166 = arith.remsi %162, %165 : vector<16x1xi32>
    %c0_i32_82 = arith.constant 0 : i32
    %167 = vector.broadcast %c0_i32_82 : i32 to vector<16x1xi32>
    %168 = arith.cmpi ne, %166, %167 : vector<16x1xi32>
    %c0_i32_83 = arith.constant 0 : i32
    %169 = vector.broadcast %c0_i32_83 : i32 to vector<16x1xi32>
    %170 = arith.cmpi slt, %166, %169 : vector<16x1xi32>
    %c0_i32_84 = arith.constant 0 : i32
    %171 = arith.cmpi slt, %164, %c0_i32_84 : i32
    %172 = vector.broadcast %171 : i1 to vector<16x1xi1>
    %173 = vector.broadcast %172 : vector<16x1xi1> to vector<16x1xi1>
    %174 = arith.xori %170, %173 : vector<16x1xi1>
    %175 = arith.andi %174, %168 : vector<16x1xi1>
    %176 = vector.broadcast %164 : i32 to vector<16x1xi32>
    %177 = arith.addi %166, %176 : vector<16x1xi32>
    %178 = arith.select %175, %177, %166 : vector<16x1xi1>, vector<16x1xi32>
    %c1_i32_85 = arith.constant 1 : i32
    %179 = tpu.dynamic_rotate %157 by %c1_i32_85 dim 0 : vector<16x32xf32>, i32 -> vector<16x32xf32>
    %c-1_i32 = arith.constant -1 : i32
    %180 = vector.broadcast %c-1_i32 : i32 to vector<16x1xi32>
    %181 = arith.addi %178, %180 : vector<16x1xi32>
    %c0_i32_86 = arith.constant 0 : i32
    %182 = vector.broadcast %c0_i32_86 : i32 to vector<16x1xi32>
    %183 = arith.cmpi sge, %181, %182 : vector<16x1xi32>
    %c-1_i32_87 = arith.constant -1 : i32
    %184 = vector.broadcast %c-1_i32_87 : i32 to vector<16x1xi32>
    %185 = arith.addi %178, %184 : vector<16x1xi32>
    %c8_i32_88 = arith.constant 8 : i32
    %186 = vector.broadcast %c8_i32_88 : i32 to vector<16x1xi32>
    %187 = arith.cmpi slt, %185, %186 : vector<16x1xi32>
    %188 = arith.andi %183, %187 : vector<16x1xi1>
    %cst_89 = arith.constant 0.000000e+00 : f32
    %189 = vector.shape_cast %188 : vector<16x1xi1> to vector<16x1xi1>
    %190 = vector.broadcast %189 : vector<16x1xi1> to vector<16x32xi1>
    %191 = vector.broadcast %cst_89 : f32 to vector<16x32xf32>
    %192 = arith.select %190, %179, %191 : vector<16x32xi1>, vector<16x32xf32>
    %193 = arith.truncf %192 : vector<16x32xf32> to vector<16x32xbf16>
    %cst_90 = arith.constant dense<0.000000e+00> : vector<16x48xf32>
    %194 = tpu.matmul %193, %17, %cst_90 {dimension_numbers = #tpu.dot_dimension_numbers<[1], [0], [0], [1], [0, 0, 1, 1], [], []>} : vector<16x32xbf16>, vector<32x48xbf16>, vector<16x48xf32> -> vector<16x48xf32>
    %195 = arith.addf %161, %194 : vector<16x48xf32>
    %c15_i32 = arith.constant 15 : i32
    %196 = tpu.dynamic_rotate %157 by %c15_i32 dim 0 : vector<16x32xf32>, i32 -> vector<16x32xf32>
    %c1_i32_91 = arith.constant 1 : i32
    %197 = vector.broadcast %c1_i32_91 : i32 to vector<16x1xi32>
    %198 = arith.addi %178, %197 : vector<16x1xi32>
    %c0_i32_92 = arith.constant 0 : i32
    %199 = vector.broadcast %c0_i32_92 : i32 to vector<16x1xi32>
    %200 = arith.cmpi sge, %198, %199 : vector<16x1xi32>
    %c1_i32_93 = arith.constant 1 : i32
    %201 = vector.broadcast %c1_i32_93 : i32 to vector<16x1xi32>
    %202 = arith.addi %178, %201 : vector<16x1xi32>
    %c8_i32_94 = arith.constant 8 : i32
    %203 = vector.broadcast %c8_i32_94 : i32 to vector<16x1xi32>
    %204 = arith.cmpi slt, %202, %203 : vector<16x1xi32>
    %205 = arith.andi %200, %204 : vector<16x1xi1>
    %cst_95 = arith.constant 0.000000e+00 : f32
    %206 = vector.shape_cast %205 : vector<16x1xi1> to vector<16x1xi1>
    %207 = vector.broadcast %206 : vector<16x1xi1> to vector<16x32xi1>
    %208 = vector.broadcast %cst_95 : f32 to vector<16x32xf32>
    %209 = arith.select %207, %196, %208 : vector<16x32xi1>, vector<16x32xf32>
    %210 = arith.truncf %209 : vector<16x32xf32> to vector<16x32xbf16>
    %cst_96 = arith.constant dense<0.000000e+00> : vector<16x48xf32>
    %211 = tpu.matmul %210, %21, %cst_96 {dimension_numbers = #tpu.dot_dimension_numbers<[1], [0], [0], [1], [0, 0, 1, 1], [], []>} : vector<16x32xbf16>, vector<32x48xbf16>, vector<16x48xf32> -> vector<16x48xf32>
    %212 = arith.addf %195, %211 : vector<16x48xf32>
    %cst_97 = arith.constant 0.000000e+00 : f32
    %213 = vector.broadcast %cst_97 : f32 to vector<16x48xf32>
    %214 = arith.maximumf %212, %213 : vector<16x48xf32>
    %215 = arith.truncf %214 : vector<16x48xf32> to vector<16x48xbf16>
    %cst_98 = arith.constant dense<0.000000e+00> : vector<16x32xf32>
    %216 = tpu.matmul %215, %27, %cst_98 {dimension_numbers = #tpu.dot_dimension_numbers<[1], [0], [0], [1], [0, 0, 1, 1], [], []>} : vector<16x48xbf16>, vector<48x32xbf16>, vector<16x32xf32> -> vector<16x32xf32>
    %217 = vector.broadcast %31 : vector<1x32xf32> to vector<16x32xf32>
    %218 = arith.addf %216, %217 : vector<16x32xf32>
    %219 = tpu.iota {dimensions = array<i32: 0>} : vector<16x1xi32>
    %c8_i32_99 = arith.constant 8 : i32
    %c0_i32_100 = arith.constant 0 : i32
    %220 = arith.cmpi eq, %c8_i32_99, %c0_i32_100 : i32
    %c1_i32_101 = arith.constant 1 : i32
    %221 = arith.select %220, %c1_i32_101, %c8_i32_99 : i32
    %222 = vector.broadcast %221 : i32 to vector<16x1xi32>
    %223 = arith.remsi %219, %222 : vector<16x1xi32>
    %c0_i32_102 = arith.constant 0 : i32
    %224 = vector.broadcast %c0_i32_102 : i32 to vector<16x1xi32>
    %225 = arith.cmpi ne, %223, %224 : vector<16x1xi32>
    %c0_i32_103 = arith.constant 0 : i32
    %226 = vector.broadcast %c0_i32_103 : i32 to vector<16x1xi32>
    %227 = arith.cmpi slt, %223, %226 : vector<16x1xi32>
    %c0_i32_104 = arith.constant 0 : i32
    %228 = arith.cmpi slt, %221, %c0_i32_104 : i32
    %229 = vector.broadcast %228 : i1 to vector<16x1xi1>
    %230 = vector.broadcast %229 : vector<16x1xi1> to vector<16x1xi1>
    %231 = arith.xori %227, %230 : vector<16x1xi1>
    %232 = arith.andi %231, %225 : vector<16x1xi1>
    %233 = vector.broadcast %221 : i32 to vector<16x1xi32>
    %234 = arith.addi %223, %233 : vector<16x1xi32>
    %235 = arith.select %232, %234, %223 : vector<16x1xi1>, vector<16x1xi32>
    %c1_i32_105 = arith.constant 1 : i32
    %236 = tpu.dynamic_rotate %214 by %c1_i32_105 dim 0 : vector<16x48xf32>, i32 -> vector<16x48xf32>
    %c-1_i32_106 = arith.constant -1 : i32
    %237 = vector.broadcast %c-1_i32_106 : i32 to vector<16x1xi32>
    %238 = arith.addi %235, %237 : vector<16x1xi32>
    %c0_i32_107 = arith.constant 0 : i32
    %239 = vector.broadcast %c0_i32_107 : i32 to vector<16x1xi32>
    %240 = arith.cmpi sge, %238, %239 : vector<16x1xi32>
    %c-1_i32_108 = arith.constant -1 : i32
    %241 = vector.broadcast %c-1_i32_108 : i32 to vector<16x1xi32>
    %242 = arith.addi %235, %241 : vector<16x1xi32>
    %c8_i32_109 = arith.constant 8 : i32
    %243 = vector.broadcast %c8_i32_109 : i32 to vector<16x1xi32>
    %244 = arith.cmpi slt, %242, %243 : vector<16x1xi32>
    %245 = arith.andi %240, %244 : vector<16x1xi1>
    %cst_110 = arith.constant 0.000000e+00 : f32
    %246 = vector.shape_cast %245 : vector<16x1xi1> to vector<16x1xi1>
    %247 = vector.broadcast %246 : vector<16x1xi1> to vector<16x48xi1>
    %248 = vector.broadcast %cst_110 : f32 to vector<16x48xf32>
    %249 = arith.select %247, %236, %248 : vector<16x48xi1>, vector<16x48xf32>
    %250 = arith.truncf %249 : vector<16x48xf32> to vector<16x48xbf16>
    %cst_111 = arith.constant dense<0.000000e+00> : vector<16x32xf32>
    %251 = tpu.matmul %250, %25, %cst_111 {dimension_numbers = #tpu.dot_dimension_numbers<[1], [0], [0], [1], [0, 0, 1, 1], [], []>} : vector<16x48xbf16>, vector<48x32xbf16>, vector<16x32xf32> -> vector<16x32xf32>
    %252 = arith.addf %218, %251 : vector<16x32xf32>
    %c15_i32_112 = arith.constant 15 : i32
    %253 = tpu.dynamic_rotate %214 by %c15_i32_112 dim 0 : vector<16x48xf32>, i32 -> vector<16x48xf32>
    %c1_i32_113 = arith.constant 1 : i32
    %254 = vector.broadcast %c1_i32_113 : i32 to vector<16x1xi32>
    %255 = arith.addi %235, %254 : vector<16x1xi32>
    %c0_i32_114 = arith.constant 0 : i32
    %256 = vector.broadcast %c0_i32_114 : i32 to vector<16x1xi32>
    %257 = arith.cmpi sge, %255, %256 : vector<16x1xi32>
    %c1_i32_115 = arith.constant 1 : i32
    %258 = vector.broadcast %c1_i32_115 : i32 to vector<16x1xi32>
    %259 = arith.addi %235, %258 : vector<16x1xi32>
    %c8_i32_116 = arith.constant 8 : i32
    %260 = vector.broadcast %c8_i32_116 : i32 to vector<16x1xi32>
    %261 = arith.cmpi slt, %259, %260 : vector<16x1xi32>
    %262 = arith.andi %257, %261 : vector<16x1xi1>
    %cst_117 = arith.constant 0.000000e+00 : f32
    %263 = vector.shape_cast %262 : vector<16x1xi1> to vector<16x1xi1>
    %264 = vector.broadcast %263 : vector<16x1xi1> to vector<16x48xi1>
    %265 = vector.broadcast %cst_117 : f32 to vector<16x48xf32>
    %266 = arith.select %264, %253, %265 : vector<16x48xi1>, vector<16x48xf32>
    %267 = arith.truncf %266 : vector<16x48xf32> to vector<16x48xbf16>
    %cst_118 = arith.constant dense<0.000000e+00> : vector<16x32xf32>
    %268 = tpu.matmul %267, %29, %cst_118 {dimension_numbers = #tpu.dot_dimension_numbers<[1], [0], [0], [1], [0, 0, 1, 1], [], []>} : vector<16x48xbf16>, vector<48x32xbf16>, vector<16x32xf32> -> vector<16x32xf32>
    %269 = arith.addf %252, %268 : vector<16x32xf32>
    %cst_119 = arith.constant 0.000000e+00 : f32
    %270 = vector.broadcast %cst_119 : f32 to vector<16x32xf32>
    %271 = arith.maximumf %269, %270 : vector<16x32xf32>
    %272 = arith.addf %271, %157 : vector<16x32xf32>
    %cst_120 = arith.constant dense<0.000000e+00> : vector<16xf32>
    %273 = vector.multi_reduction <add>, %272, %cst_120 [1] : vector<16x32xf32> to vector<16xf32>
    %274 = vector.shape_cast %273 : vector<16xf32> to vector<16x1xf32>
    %cst_121 = arith.constant 3.200000e+01 : f32
    %275 = vector.broadcast %cst_121 : f32 to vector<16x1xf32>
    %276 = arith.divf %274, %275 : vector<16x1xf32>
    %277 = arith.mulf %272, %272 : vector<16x32xf32>
    %cst_122 = arith.constant dense<0.000000e+00> : vector<16xf32>
    %278 = vector.multi_reduction <add>, %277, %cst_122 [1] : vector<16x32xf32> to vector<16xf32>
    %279 = vector.shape_cast %278 : vector<16xf32> to vector<16x1xf32>
    %cst_123 = arith.constant 3.200000e+01 : f32
    %280 = vector.broadcast %cst_123 : f32 to vector<16x1xf32>
    %281 = arith.divf %279, %280 : vector<16x1xf32>
    %282 = arith.mulf %276, %276 : vector<16x1xf32>
    %283 = arith.subf %281, %282 : vector<16x1xf32>
    %cst_124 = arith.constant 0.000000e+00 : f32
    %284 = vector.broadcast %cst_124 : f32 to vector<16x1xf32>
    %285 = arith.maximumf %283, %284 : vector<16x1xf32>
    %286 = vector.broadcast %276 : vector<16x1xf32> to vector<16x32xf32>
    %287 = arith.subf %272, %286 : vector<16x32xf32>
    %cst_125 = arith.constant 9.99999974E-6 : f32
    %288 = vector.broadcast %cst_125 : f32 to vector<16x1xf32>
    %289 = arith.addf %285, %288 : vector<16x1xf32>
    %290 = math.rsqrt %289 : vector<16x1xf32>
    %291 = vector.broadcast %290 : vector<16x1xf32> to vector<16x32xf32>
    %292 = arith.mulf %287, %291 : vector<16x32xf32>
    %293 = vector.broadcast %33 : vector<1x32xf32> to vector<16x32xf32>
    %294 = arith.mulf %292, %293 : vector<16x32xf32>
    %295 = vector.broadcast %35 : vector<1x32xf32> to vector<16x32xf32>
    %296 = arith.addf %294, %295 : vector<16x32xf32>
    %c0_126 = arith.constant 0 : index
    %c0_127 = arith.constant 0 : index
    %297 = vector.load %arg28[%c0_126, %c0_127] : memref<16x32xf32, #tpu.memory_space<vmem>>, vector<16x32xf32>
    tpu.vector_store %arg28[%c0_126, %c0_127], %296 {strides = array<i32>} : memref<16x32xf32, #tpu.memory_space<vmem>>, vector<16x32xf32>,
    %c1_i32_128 = arith.constant 1 : i32
    %298 = arith.cmpi eq, %arg1, %c1_i32_128 : i32
    %299 = arith.extui %298 : i1 to i32
    %c0_i32_129 = arith.constant 0 : i32
    %300 = arith.cmpi ne, %299, %c0_i32_129 : i32
    scf.if %300 {
      %301 = vector.shape_cast %296 : vector<16x32xf32> to vector<2x8x32xf32>
      %c0_130 = arith.constant 0 : index
      %c0_131 = arith.constant 0 : index
      %c0_132 = arith.constant 0 : index
      %302 = vector.load %arg26[%c0_130, %c0_131, %c0_132] : memref<2x8x32xf32, #tpu.memory_space<vmem>>, vector<2x8x32xf32>
      tpu.vector_store %arg26[%c0_130, %c0_131, %c0_132], %301 {strides = array<i32>} : memref<2x8x32xf32, #tpu.memory_space<vmem>>, vector<2x8x32xf32>,
      %c0_133 = arith.constant 0 : index
      %c0_134 = arith.constant 0 : index
      %c0_135 = arith.constant 0 : index
      %303 = vector.load %arg16[%c0_133, %c0_134, %c0_135] : memref<3x32x24xbf16, #tpu.memory_space<vmem>>, vector<1x32x24xbf16>
      %304 = vector.shape_cast %303 : vector<1x32x24xbf16> to vector<32x24xbf16>
      %c1_136 = arith.constant 1 : index
      %c0_137 = arith.constant 0 : index
      %c0_138 = arith.constant 0 : index
      %305 = vector.load %arg16[%c1_136, %c0_137, %c0_138] : memref<3x32x24xbf16, #tpu.memory_space<vmem>>, vector<1x32x24xbf16>
      %306 = vector.shape_cast %305 : vector<1x32x24xbf16> to vector<32x24xbf16>
      %c2_139 = arith.constant 2 : index
      %c0_140 = arith.constant 0 : index
      %c0_141 = arith.constant 0 : index
      %307 = vector.load %arg16[%c2_139, %c0_140, %c0_141] : memref<3x32x24xbf16, #tpu.memory_space<vmem>>, vector<1x32x24xbf16>
      %308 = vector.shape_cast %307 : vector<1x32x24xbf16> to vector<32x24xbf16>
      %c0_142 = arith.constant 0 : index
      %c0_143 = arith.constant 0 : index
      %309 = vector.load %arg17[%c0_142, %c0_143] : memref<1x24xf32, #tpu.memory_space<vmem>>, vector<1x24xf32>
      %310 = arith.truncf %296 : vector<16x32xf32> to vector<16x32xbf16>
      %cst_144 = arith.constant dense<0.000000e+00> : vector<16x24xf32>
      %311 = tpu.matmul %310, %306, %cst_144 {dimension_numbers = #tpu.dot_dimension_numbers<[1], [0], [0], [1], [0, 0, 1, 1], [], []>} : vector<16x32xbf16>, vector<32x24xbf16>, vector<16x24xf32> -> vector<16x24xf32>
      %312 = vector.broadcast %309 : vector<1x24xf32> to vector<16x24xf32>
      %313 = arith.addf %311, %312 : vector<16x24xf32>
      %314 = tpu.iota {dimensions = array<i32: 0>} : vector<16x1xi32>
      %c8_i32_145 = arith.constant 8 : i32
      %c0_i32_146 = arith.constant 0 : i32
      %315 = arith.cmpi eq, %c8_i32_145, %c0_i32_146 : i32
      %c1_i32_147 = arith.constant 1 : i32
      %316 = arith.select %315, %c1_i32_147, %c8_i32_145 : i32
      %317 = vector.broadcast %316 : i32 to vector<16x1xi32>
      %318 = arith.remsi %314, %317 : vector<16x1xi32>
      %c0_i32_148 = arith.constant 0 : i32
      %319 = vector.broadcast %c0_i32_148 : i32 to vector<16x1xi32>
      %320 = arith.cmpi ne, %318, %319 : vector<16x1xi32>
      %c0_i32_149 = arith.constant 0 : i32
      %321 = vector.broadcast %c0_i32_149 : i32 to vector<16x1xi32>
      %322 = arith.cmpi slt, %318, %321 : vector<16x1xi32>
      %c0_i32_150 = arith.constant 0 : i32
      %323 = arith.cmpi slt, %316, %c0_i32_150 : i32
      %324 = vector.broadcast %323 : i1 to vector<16x1xi1>
      %325 = vector.broadcast %324 : vector<16x1xi1> to vector<16x1xi1>
      %326 = arith.xori %322, %325 : vector<16x1xi1>
      %327 = arith.andi %326, %320 : vector<16x1xi1>
      %328 = vector.broadcast %316 : i32 to vector<16x1xi32>
      %329 = arith.addi %318, %328 : vector<16x1xi32>
      %330 = arith.select %327, %329, %318 : vector<16x1xi1>, vector<16x1xi32>
      %c1_i32_151 = arith.constant 1 : i32
      %331 = tpu.dynamic_rotate %296 by %c1_i32_151 dim 0 : vector<16x32xf32>, i32 -> vector<16x32xf32>
      %c-1_i32_152 = arith.constant -1 : i32
      %332 = vector.broadcast %c-1_i32_152 : i32 to vector<16x1xi32>
      %333 = arith.addi %330, %332 : vector<16x1xi32>
      %c0_i32_153 = arith.constant 0 : i32
      %334 = vector.broadcast %c0_i32_153 : i32 to vector<16x1xi32>
      %335 = arith.cmpi sge, %333, %334 : vector<16x1xi32>
      %c-1_i32_154 = arith.constant -1 : i32
      %336 = vector.broadcast %c-1_i32_154 : i32 to vector<16x1xi32>
      %337 = arith.addi %330, %336 : vector<16x1xi32>
      %c8_i32_155 = arith.constant 8 : i32
      %338 = vector.broadcast %c8_i32_155 : i32 to vector<16x1xi32>
      %339 = arith.cmpi slt, %337, %338 : vector<16x1xi32>
      %340 = arith.andi %335, %339 : vector<16x1xi1>
      %cst_156 = arith.constant 0.000000e+00 : f32
      %341 = vector.shape_cast %340 : vector<16x1xi1> to vector<16x1xi1>
      %342 = vector.broadcast %341 : vector<16x1xi1> to vector<16x32xi1>
      %343 = vector.broadcast %cst_156 : f32 to vector<16x32xf32>
      %344 = arith.select %342, %331, %343 : vector<16x32xi1>, vector<16x32xf32>
      %345 = arith.truncf %344 : vector<16x32xf32> to vector<16x32xbf16>
      %cst_157 = arith.constant dense<0.000000e+00> : vector<16x24xf32>
      %346 = tpu.matmul %345, %304, %cst_157 {dimension_numbers = #tpu.dot_dimension_numbers<[1], [0], [0], [1], [0, 0, 1, 1], [], []>} : vector<16x32xbf16>, vector<32x24xbf16>, vector<16x24xf32> -> vector<16x24xf32>
      %347 = arith.addf %313, %346 : vector<16x24xf32>
      %c15_i32_158 = arith.constant 15 : i32
      %348 = tpu.dynamic_rotate %296 by %c15_i32_158 dim 0 : vector<16x32xf32>, i32 -> vector<16x32xf32>
      %c1_i32_159 = arith.constant 1 : i32
      %349 = vector.broadcast %c1_i32_159 : i32 to vector<16x1xi32>
      %350 = arith.addi %330, %349 : vector<16x1xi32>
      %c0_i32_160 = arith.constant 0 : i32
      %351 = vector.broadcast %c0_i32_160 : i32 to vector<16x1xi32>
      %352 = arith.cmpi sge, %350, %351 : vector<16x1xi32>
      %c1_i32_161 = arith.constant 1 : i32
      %353 = vector.broadcast %c1_i32_161 : i32 to vector<16x1xi32>
      %354 = arith.addi %330, %353 : vector<16x1xi32>
      %c8_i32_162 = arith.constant 8 : i32
      %355 = vector.broadcast %c8_i32_162 : i32 to vector<16x1xi32>
      %356 = arith.cmpi slt, %354, %355 : vector<16x1xi32>
      %357 = arith.andi %352, %356 : vector<16x1xi1>
      %cst_163 = arith.constant 0.000000e+00 : f32
      %358 = vector.shape_cast %357 : vector<16x1xi1> to vector<16x1xi1>
      %359 = vector.broadcast %358 : vector<16x1xi1> to vector<16x32xi1>
      %360 = vector.broadcast %cst_163 : f32 to vector<16x32xf32>
      %361 = arith.select %359, %348, %360 : vector<16x32xi1>, vector<16x32xf32>
      %362 = arith.truncf %361 : vector<16x32xf32> to vector<16x32xbf16>
      %cst_164 = arith.constant dense<0.000000e+00> : vector<16x24xf32>
      %363 = tpu.matmul %362, %308, %cst_164 {dimension_numbers = #tpu.dot_dimension_numbers<[1], [0], [0], [1], [0, 0, 1, 1], [], []>} : vector<16x32xbf16>, vector<32x24xbf16>, vector<16x24xf32> -> vector<16x24xf32>
      %364 = arith.addf %347, %363 : vector<16x24xf32>
      %cst_165 = arith.constant 0.000000e+00 : f32
      %365 = vector.broadcast %cst_165 : f32 to vector<16x24xf32>
      %366 = arith.maximumf %364, %365 : vector<16x24xf32>
      %c0_166 = arith.constant 0 : index
      %c0_167 = arith.constant 0 : index
      %367 = vector.load %arg18[%c0_166, %c0_167] : memref<1x24xf32, #tpu.memory_space<vmem>>, vector<1x24xf32>
      %c0_168 = arith.constant 0 : index
      %c0_169 = arith.constant 0 : index
      %368 = vector.load %arg19[%c0_168, %c0_169] : memref<1x24xf32, #tpu.memory_space<vmem>>, vector<1x24xf32>
      %cst_170 = arith.constant dense<0.000000e+00> : vector<16xf32>
      %369 = vector.multi_reduction <add>, %366, %cst_170 [1] : vector<16x24xf32> to vector<16xf32>
      %370 = vector.shape_cast %369 : vector<16xf32> to vector<16x1xf32>
      %cst_171 = arith.constant 2.400000e+01 : f32
      %371 = vector.broadcast %cst_171 : f32 to vector<16x1xf32>
      %372 = arith.divf %370, %371 : vector<16x1xf32>
      %373 = arith.mulf %366, %366 : vector<16x24xf32>
      %cst_172 = arith.constant dense<0.000000e+00> : vector<16xf32>
      %374 = vector.multi_reduction <add>, %373, %cst_172 [1] : vector<16x24xf32> to vector<16xf32>
      %375 = vector.shape_cast %374 : vector<16xf32> to vector<16x1xf32>
      %cst_173 = arith.constant 2.400000e+01 : f32
      %376 = vector.broadcast %cst_173 : f32 to vector<16x1xf32>
      %377 = arith.divf %375, %376 : vector<16x1xf32>
      %378 = arith.mulf %372, %372 : vector<16x1xf32>
      %379 = arith.subf %377, %378 : vector<16x1xf32>
      %cst_174 = arith.constant 0.000000e+00 : f32
      %380 = vector.broadcast %cst_174 : f32 to vector<16x1xf32>
      %381 = arith.maximumf %379, %380 : vector<16x1xf32>
      %382 = vector.broadcast %372 : vector<16x1xf32> to vector<16x24xf32>
      %383 = arith.subf %366, %382 : vector<16x24xf32>
      %cst_175 = arith.constant 9.99999974E-6 : f32
      %384 = vector.broadcast %cst_175 : f32 to vector<16x1xf32>
      %385 = arith.addf %381, %384 : vector<16x1xf32>
      %386 = math.rsqrt %385 : vector<16x1xf32>
      %387 = vector.broadcast %386 : vector<16x1xf32> to vector<16x24xf32>
      %388 = arith.mulf %383, %387 : vector<16x24xf32>
      %389 = vector.broadcast %367 : vector<1x24xf32> to vector<16x24xf32>
      %390 = arith.mulf %388, %389 : vector<16x24xf32>
      %391 = vector.broadcast %368 : vector<1x24xf32> to vector<16x24xf32>
      %392 = arith.addf %390, %391 : vector<16x24xf32>
      %c0_176 = arith.constant 0 : index
      %c0_177 = arith.constant 0 : index
      %c0_178 = arith.constant 0 : index
      %393 = vector.load %arg20[%c0_176, %c0_177, %c0_178] : memref<3x24x32xbf16, #tpu.memory_space<vmem>>, vector<1x24x32xbf16>
      %394 = vector.shape_cast %393 : vector<1x24x32xbf16> to vector<24x32xbf16>
      %c1_179 = arith.constant 1 : index
      %c0_180 = arith.constant 0 : index
      %c0_181 = arith.constant 0 : index
      %395 = vector.load %arg20[%c1_179, %c0_180, %c0_181] : memref<3x24x32xbf16, #tpu.memory_space<vmem>>, vector<1x24x32xbf16>
      %396 = vector.shape_cast %395 : vector<1x24x32xbf16> to vector<24x32xbf16>
      %c2_182 = arith.constant 2 : index
      %c0_183 = arith.constant 0 : index
      %c0_184 = arith.constant 0 : index
      %397 = vector.load %arg20[%c2_182, %c0_183, %c0_184] : memref<3x24x32xbf16, #tpu.memory_space<vmem>>, vector<1x24x32xbf16>
      %398 = vector.shape_cast %397 : vector<1x24x32xbf16> to vector<24x32xbf16>
      %c0_185 = arith.constant 0 : index
      %c0_186 = arith.constant 0 : index
      %399 = vector.load %arg21[%c0_185, %c0_186] : memref<1x32xf32, #tpu.memory_space<vmem>>, vector<1x32xf32>
      %400 = arith.truncf %392 : vector<16x24xf32> to vector<16x24xbf16>
      %cst_187 = arith.constant dense<0.000000e+00> : vector<16x32xf32>
      %401 = tpu.matmul %400, %396, %cst_187 {dimension_numbers = #tpu.dot_dimension_numbers<[1], [0], [0], [1], [0, 0, 1, 1], [], []>} : vector<16x24xbf16>, vector<24x32xbf16>, vector<16x32xf32> -> vector<16x32xf32>
      %402 = vector.broadcast %399 : vector<1x32xf32> to vector<16x32xf32>
      %403 = arith.addf %401, %402 : vector<16x32xf32>
      %404 = tpu.iota {dimensions = array<i32: 0>} : vector<16x1xi32>
      %c8_i32_188 = arith.constant 8 : i32
      %c0_i32_189 = arith.constant 0 : i32
      %405 = arith.cmpi eq, %c8_i32_188, %c0_i32_189 : i32
      %c1_i32_190 = arith.constant 1 : i32
      %406 = arith.select %405, %c1_i32_190, %c8_i32_188 : i32
      %407 = vector.broadcast %406 : i32 to vector<16x1xi32>
      %408 = arith.remsi %404, %407 : vector<16x1xi32>
      %c0_i32_191 = arith.constant 0 : i32
      %409 = vector.broadcast %c0_i32_191 : i32 to vector<16x1xi32>
      %410 = arith.cmpi ne, %408, %409 : vector<16x1xi32>
      %c0_i32_192 = arith.constant 0 : i32
      %411 = vector.broadcast %c0_i32_192 : i32 to vector<16x1xi32>
      %412 = arith.cmpi slt, %408, %411 : vector<16x1xi32>
      %c0_i32_193 = arith.constant 0 : i32
      %413 = arith.cmpi slt, %406, %c0_i32_193 : i32
      %414 = vector.broadcast %413 : i1 to vector<16x1xi1>
      %415 = vector.broadcast %414 : vector<16x1xi1> to vector<16x1xi1>
      %416 = arith.xori %412, %415 : vector<16x1xi1>
      %417 = arith.andi %416, %410 : vector<16x1xi1>
      %418 = vector.broadcast %406 : i32 to vector<16x1xi32>
      %419 = arith.addi %408, %418 : vector<16x1xi32>
      %420 = arith.select %417, %419, %408 : vector<16x1xi1>, vector<16x1xi32>
      %c1_i32_194 = arith.constant 1 : i32
      %421 = tpu.dynamic_rotate %392 by %c1_i32_194 dim 0 : vector<16x24xf32>, i32 -> vector<16x24xf32>
      %c-1_i32_195 = arith.constant -1 : i32
      %422 = vector.broadcast %c-1_i32_195 : i32 to vector<16x1xi32>
      %423 = arith.addi %420, %422 : vector<16x1xi32>
      %c0_i32_196 = arith.constant 0 : i32
      %424 = vector.broadcast %c0_i32_196 : i32 to vector<16x1xi32>
      %425 = arith.cmpi sge, %423, %424 : vector<16x1xi32>
      %c-1_i32_197 = arith.constant -1 : i32
      %426 = vector.broadcast %c-1_i32_197 : i32 to vector<16x1xi32>
      %427 = arith.addi %420, %426 : vector<16x1xi32>
      %c8_i32_198 = arith.constant 8 : i32
      %428 = vector.broadcast %c8_i32_198 : i32 to vector<16x1xi32>
      %429 = arith.cmpi slt, %427, %428 : vector<16x1xi32>
      %430 = arith.andi %425, %429 : vector<16x1xi1>
      %cst_199 = arith.constant 0.000000e+00 : f32
      %431 = vector.shape_cast %430 : vector<16x1xi1> to vector<16x1xi1>
      %432 = vector.broadcast %431 : vector<16x1xi1> to vector<16x24xi1>
      %433 = vector.broadcast %cst_199 : f32 to vector<16x24xf32>
      %434 = arith.select %432, %421, %433 : vector<16x24xi1>, vector<16x24xf32>
      %435 = arith.truncf %434 : vector<16x24xf32> to vector<16x24xbf16>
      %cst_200 = arith.constant dense<0.000000e+00> : vector<16x32xf32>
      %436 = tpu.matmul %435, %394, %cst_200 {dimension_numbers = #tpu.dot_dimension_numbers<[1], [0], [0], [1], [0, 0, 1, 1], [], []>} : vector<16x24xbf16>, vector<24x32xbf16>, vector<16x32xf32> -> vector<16x32xf32>
      %437 = arith.addf %403, %436 : vector<16x32xf32>
      %c15_i32_201 = arith.constant 15 : i32
      %438 = tpu.dynamic_rotate %392 by %c15_i32_201 dim 0 : vector<16x24xf32>, i32 -> vector<16x24xf32>
      %c1_i32_202 = arith.constant 1 : i32
      %439 = vector.broadcast %c1_i32_202 : i32 to vector<16x1xi32>
      %440 = arith.addi %420, %439 : vector<16x1xi32>
      %c0_i32_203 = arith.constant 0 : i32
      %441 = vector.broadcast %c0_i32_203 : i32 to vector<16x1xi32>
      %442 = arith.cmpi sge, %440, %441 : vector<16x1xi32>
      %c1_i32_204 = arith.constant 1 : i32
      %443 = vector.broadcast %c1_i32_204 : i32 to vector<16x1xi32>
      %444 = arith.addi %420, %443 : vector<16x1xi32>
      %c8_i32_205 = arith.constant 8 : i32
      %445 = vector.broadcast %c8_i32_205 : i32 to vector<16x1xi32>
      %446 = arith.cmpi slt, %444, %445 : vector<16x1xi32>
      %447 = arith.andi %442, %446 : vector<16x1xi1>
      %cst_206 = arith.constant 0.000000e+00 : f32
      %448 = vector.shape_cast %447 : vector<16x1xi1> to vector<16x1xi1>
      %449 = vector.broadcast %448 : vector<16x1xi1> to vector<16x24xi1>
      %450 = vector.broadcast %cst_206 : f32 to vector<16x24xf32>
      %451 = arith.select %449, %438, %450 : vector<16x24xi1>, vector<16x24xf32>
      %452 = arith.truncf %451 : vector<16x24xf32> to vector<16x24xbf16>
      %cst_207 = arith.constant dense<0.000000e+00> : vector<16x32xf32>
      %453 = tpu.matmul %452, %398, %cst_207 {dimension_numbers = #tpu.dot_dimension_numbers<[1], [0], [0], [1], [0, 0, 1, 1], [], []>} : vector<16x24xbf16>, vector<24x32xbf16>, vector<16x32xf32> -> vector<16x32xf32>
      %454 = arith.addf %437, %453 : vector<16x32xf32>
      %cst_208 = arith.constant 0.000000e+00 : f32
      %455 = vector.broadcast %cst_208 : f32 to vector<16x32xf32>
      %456 = arith.maximumf %454, %455 : vector<16x32xf32>
      %c0_209 = arith.constant 0 : index
      %c0_210 = arith.constant 0 : index
      %457 = vector.load %arg22[%c0_209, %c0_210] : memref<1x32xf32, #tpu.memory_space<vmem>>, vector<1x32xf32>
      %c0_211 = arith.constant 0 : index
      %c0_212 = arith.constant 0 : index
      %458 = vector.load %arg23[%c0_211, %c0_212] : memref<1x32xf32, #tpu.memory_space<vmem>>, vector<1x32xf32>
      %cst_213 = arith.constant dense<0.000000e+00> : vector<16xf32>
      %459 = vector.multi_reduction <add>, %456, %cst_213 [1] : vector<16x32xf32> to vector<16xf32>
      %460 = vector.shape_cast %459 : vector<16xf32> to vector<16x1xf32>
      %cst_214 = arith.constant 3.200000e+01 : f32
      %461 = vector.broadcast %cst_214 : f32 to vector<16x1xf32>
      %462 = arith.divf %460, %461 : vector<16x1xf32>
      %463 = arith.mulf %456, %456 : vector<16x32xf32>
      %cst_215 = arith.constant dense<0.000000e+00> : vector<16xf32>
      %464 = vector.multi_reduction <add>, %463, %cst_215 [1] : vector<16x32xf32> to vector<16xf32>
      %465 = vector.shape_cast %464 : vector<16xf32> to vector<16x1xf32>
      %cst_216 = arith.constant 3.200000e+01 : f32
      %466 = vector.broadcast %cst_216 : f32 to vector<16x1xf32>
      %467 = arith.divf %465, %466 : vector<16x1xf32>
      %468 = arith.mulf %462, %462 : vector<16x1xf32>
      %469 = arith.subf %467, %468 : vector<16x1xf32>
      %cst_217 = arith.constant 0.000000e+00 : f32
      %470 = vector.broadcast %cst_217 : f32 to vector<16x1xf32>
      %471 = arith.maximumf %469, %470 : vector<16x1xf32>
      %472 = vector.broadcast %462 : vector<16x1xf32> to vector<16x32xf32>
      %473 = arith.subf %456, %472 : vector<16x32xf32>
      %cst_218 = arith.constant 9.99999974E-6 : f32
      %474 = vector.broadcast %cst_218 : f32 to vector<16x1xf32>
      %475 = arith.addf %471, %474 : vector<16x1xf32>
      %476 = math.rsqrt %475 : vector<16x1xf32>
      %477 = vector.broadcast %476 : vector<16x1xf32> to vector<16x32xf32>
      %478 = arith.mulf %473, %477 : vector<16x32xf32>
      %479 = vector.broadcast %457 : vector<1x32xf32> to vector<16x32xf32>
      %480 = arith.mulf %478, %479 : vector<16x32xf32>
      %481 = vector.broadcast %458 : vector<1x32xf32> to vector<16x32xf32>
      %482 = arith.addf %480, %481 : vector<16x32xf32>
      %c0_219 = arith.constant 0 : index
      %c0_220 = arith.constant 0 : index
      %483 = vector.load %arg24[%c0_219, %c0_220] : memref<32x128xbf16, #tpu.memory_space<vmem>>, vector<32x128xbf16>
      %484 = arith.truncf %482 : vector<16x32xf32> to vector<16x32xbf16>
      %cst_221 = arith.constant dense<0.000000e+00> : vector<16x128xf32>
      %485 = tpu.matmul %484, %483, %cst_221 {dimension_numbers = #tpu.dot_dimension_numbers<[1], [0], [0], [1], [0, 0, 1, 1], [], []>} : vector<16x32xbf16>, vector<32x128xbf16>, vector<16x128xf32> -> vector<16x128xf32>
      %c0_222 = arith.constant 0 : index
      %c0_223 = arith.constant 0 : index
      %486 = vector.load %arg25[%c0_222, %c0_223] : memref<1x128xf32, #tpu.memory_space<vmem>>, vector<1x128xf32>
      %487 = vector.broadcast %486 : vector<1x128xf32> to vector<16x128xf32>
      %488 = arith.addf %485, %487 : vector<16x128xf32>
      %489 = vector.shape_cast %488 : vector<16x128xf32> to vector<2x8x128xf32>
      %c0_224 = arith.constant 0 : index
      %c0_225 = arith.constant 0 : index
      %c0_226 = arith.constant 0 : index
      %490 = vector.load %arg27[%c0_224, %c0_225, %c0_226] : memref<2x8x128xf32, #tpu.memory_space<vmem>>, vector<2x8x128xf32>
      tpu.vector_store %arg27[%c0_224, %c0_225, %c0_226], %489 {strides = array<i32>} : memref<2x8x128xf32, #tpu.memory_space<vmem>>, vector<2x8x128xf32>,
    } else {
    }
    return
  }
  func.func @transform_0(%arg0: i32, %arg1: i32) -> (i32, i32, i32) {
    %c0_i32 = arith.constant 0 : i32
    %c0_i32_0 = arith.constant 0 : i32
    %c0_i32_1 = arith.constant 0 : i32
    return %arg0, %c0_i32, %c0_i32_0 : i32, i32, i32
  }
  func.func @transform_1(%arg0: i32, %arg1: i32) -> (i32, i32) {
    %c0_i32 = arith.constant 0 : i32
    %c0_i32_0 = arith.constant 0 : i32
    %c0_i32_1 = arith.constant 0 : i32
    return %c0_i32, %c0_i32_0 : i32, i32
  }
  func.func @transform_2(%arg0: i32, %arg1: i32) -> (i32, i32, i32) {
    %c0_i32 = arith.constant 0 : i32
    %c0_i32_0 = arith.constant 0 : i32
    %c0_i32_1 = arith.constant 0 : i32
    return %arg1, %c0_i32, %c0_i32_0 : i32, i32, i32
  }
  func.func @transform_3(%arg0: i32, %arg1: i32) -> (i32, i32, i32) {
    %c0_i32 = arith.constant 0 : i32
    %c0_i32_0 = arith.constant 0 : i32
    %c0_i32_1 = arith.constant 0 : i32
    return %arg1, %c0_i32, %c0_i32_0 : i32, i32, i32
  }
  func.func @transform_4(%arg0: i32, %arg1: i32) -> (i32, i32, i32) {
    %c0_i32 = arith.constant 0 : i32
    %c0_i32_0 = arith.constant 0 : i32
    %c0_i32_1 = arith.constant 0 : i32
    return %arg1, %c0_i32, %c0_i32_0 : i32, i32, i32
  }
  func.func @transform_5(%arg0: i32, %arg1: i32) -> (i32, i32, i32) {
    %c0_i32 = arith.constant 0 : i32
    %c0_i32_0 = arith.constant 0 : i32
    %c0_i32_1 = arith.constant 0 : i32
    return %arg1, %c0_i32, %c0_i32_0 : i32, i32, i32
  }
  func.func @transform_6(%arg0: i32, %arg1: i32) -> (i32, i32, i32) {
    %c0_i32 = arith.constant 0 : i32
    %c0_i32_0 = arith.constant 0 : i32
    %c0_i32_1 = arith.constant 0 : i32
    return %arg1, %c0_i32, %c0_i32_0 : i32, i32, i32
  }
  func.func @transform_7(%arg0: i32, %arg1: i32) -> (i32, i32, i32) {
    %c0_i32 = arith.constant 0 : i32
    %c0_i32_0 = arith.constant 0 : i32
    %c0_i32_1 = arith.constant 0 : i32
    return %arg1, %c0_i32, %c0_i32_0 : i32, i32, i32
  }
  func.func @transform_8(%arg0: i32, %arg1: i32) -> (i32, i32, i32, i32) {
    %c0_i32 = arith.constant 0 : i32
    %c0_i32_0 = arith.constant 0 : i32
    %c0_i32_1 = arith.constant 0 : i32
    %c0_i32_2 = arith.constant 0 : i32
    return %arg1, %c0_i32, %c0_i32_0, %c0_i32_1 : i32, i32, i32, i32
  }
  func.func @transform_9(%arg0: i32, %arg1: i32) -> (i32, i32, i32) {
    %c0_i32 = arith.constant 0 : i32
    %c0_i32_0 = arith.constant 0 : i32
    %c0_i32_1 = arith.constant 0 : i32
    return %arg1, %c0_i32, %c0_i32_0 : i32, i32, i32
  }
  func.func @transform_10(%arg0: i32, %arg1: i32) -> (i32, i32, i32, i32) {
    %c0_i32 = arith.constant 0 : i32
    %c0_i32_0 = arith.constant 0 : i32
    %c0_i32_1 = arith.constant 0 : i32
    %c0_i32_2 = arith.constant 0 : i32
    return %arg1, %c0_i32, %c0_i32_0, %c0_i32_1 : i32, i32, i32, i32
  }
  func.func @transform_11(%arg0: i32, %arg1: i32) -> (i32, i32, i32) {
    %c0_i32 = arith.constant 0 : i32
    %c0_i32_0 = arith.constant 0 : i32
    %c0_i32_1 = arith.constant 0 : i32
    return %arg1, %c0_i32, %c0_i32_0 : i32, i32, i32
  }
  func.func @transform_12(%arg0: i32, %arg1: i32) -> (i32, i32, i32) {
    %c0_i32 = arith.constant 0 : i32
    %c0_i32_0 = arith.constant 0 : i32
    %c0_i32_1 = arith.constant 0 : i32
    return %arg1, %c0_i32, %c0_i32_0 : i32, i32, i32
  }
  func.func @transform_13(%arg0: i32, %arg1: i32) -> (i32, i32, i32) {
    %c0_i32 = arith.constant 0 : i32
    %c0_i32_0 = arith.constant 0 : i32
    %c0_i32_1 = arith.constant 0 : i32
    return %arg1, %c0_i32, %c0_i32_0 : i32, i32, i32
  }
  func.func @transform_14(%arg0: i32, %arg1: i32) -> (i32, i32, i32) {
    %c0_i32 = arith.constant 0 : i32
    %c0_i32_0 = arith.constant 0 : i32
    %c0_i32_1 = arith.constant 0 : i32
    %c0_i32_2 = arith.constant 0 : i32
    return %c0_i32, %c0_i32_0, %c0_i32_1 : i32, i32, i32
  }
  func.func @transform_15(%arg0: i32, %arg1: i32) -> (i32, i32) {
    %c0_i32 = arith.constant 0 : i32
    %c0_i32_0 = arith.constant 0 : i32
    %c0_i32_1 = arith.constant 0 : i32
    return %c0_i32, %c0_i32_0 : i32, i32
  }
  func.func @transform_16(%arg0: i32, %arg1: i32) -> (i32, i32) {
    %c0_i32 = arith.constant 0 : i32
    %c0_i32_0 = arith.constant 0 : i32
    %c0_i32_1 = arith.constant 0 : i32
    return %c0_i32, %c0_i32_0 : i32, i32
  }
  func.func @transform_17(%arg0: i32, %arg1: i32) -> (i32, i32) {
    %c0_i32 = arith.constant 0 : i32
    %c0_i32_0 = arith.constant 0 : i32
    %c0_i32_1 = arith.constant 0 : i32
    return %c0_i32, %c0_i32_0 : i32, i32
  }
  func.func @transform_18(%arg0: i32, %arg1: i32) -> (i32, i32, i32) {
    %c0_i32 = arith.constant 0 : i32
    %c0_i32_0 = arith.constant 0 : i32
    %c0_i32_1 = arith.constant 0 : i32
    %c0_i32_2 = arith.constant 0 : i32
    return %c0_i32, %c0_i32_0, %c0_i32_1 : i32, i32, i32
  }
  func.func @transform_19(%arg0: i32, %arg1: i32) -> (i32, i32) {
    %c0_i32 = arith.constant 0 : i32
    %c0_i32_0 = arith.constant 0 : i32
    %c0_i32_1 = arith.constant 0 : i32
    return %c0_i32, %c0_i32_0 : i32, i32
  }
  func.func @transform_20(%arg0: i32, %arg1: i32) -> (i32, i32) {
    %c0_i32 = arith.constant 0 : i32
    %c0_i32_0 = arith.constant 0 : i32
    %c0_i32_1 = arith.constant 0 : i32
    return %c0_i32, %c0_i32_0 : i32, i32
  }
  func.func @transform_21(%arg0: i32, %arg1: i32) -> (i32, i32) {
    %c0_i32 = arith.constant 0 : i32
    %c0_i32_0 = arith.constant 0 : i32
    %c0_i32_1 = arith.constant 0 : i32
    return %c0_i32, %c0_i32_0 : i32, i32
  }
  func.func @transform_22(%arg0: i32, %arg1: i32) -> (i32, i32) {
    %c0_i32 = arith.constant 0 : i32
    %c0_i32_0 = arith.constant 0 : i32
    %c0_i32_1 = arith.constant 0 : i32
    return %c0_i32, %c0_i32_0 : i32, i32
  }
  func.func @transform_23(%arg0: i32, %arg1: i32) -> (i32, i32) {
    %c0_i32 = arith.constant 0 : i32
    %c0_i32_0 = arith.constant 0 : i32
    %c0_i32_1 = arith.constant 0 : i32
    return %c0_i32, %c0_i32_0 : i32, i32
  }
  func.func @transform_24(%arg0: i32, %arg1: i32) -> (i32, i32, i32) {
    %c0_i32 = arith.constant 0 : i32
    %c0_i32_0 = arith.constant 0 : i32
    %c0_i32_1 = arith.constant 0 : i32
    return %arg0, %c0_i32, %c0_i32_0 : i32, i32, i32
  }
  func.func @transform_25(%arg0: i32, %arg1: i32) -> (i32, i32, i32) {
    %c0_i32 = arith.constant 0 : i32
    %c0_i32_0 = arith.constant 0 : i32
    %c0_i32_1 = arith.constant 0 : i32
    return %arg0, %c0_i32, %c0_i32_0 : i32, i32, i32
  }
}

</mosaic_0001>

<bundles_post_ra>
// kernel: tpu_custom_call.1
= control target key start
LH: loop header
LB: loop body
LE: loop exit
PB: predicated region body
PF: predicated region fallthrough
CT: control target
= control target key end

     0   :  { %s4941_s0 = inlined_call_operand.vmem [shape: f32[2,8,32], index: 0, kind: input, shape index: {}]   ;;  %s4942_s1 = inlined_call_operand.vmem [shape: f32[8,32], index: 1, kind: input, shape index: {}]   ;;  %s4943_s2 = inlined_call_operand.vmem [shape: bf16[2,32,96], index: 2, kind: input, shape index: {}]   ;;  %s4944_s3 = inlined_call_operand.vmem [shape: f32[2,1,96], index: 3, kind: input, shape index: {}]   ;;  %s4945_s4 = inlined_call_operand.vmem [shape: bf16[2,32,32], index: 4, kind: input, shape index: {}]   ;;  %s4946_s5 = inlined_call_operand.vmem [shape: f32[2,1,32], index: 5, kind: input, shape index: {}]   ;;  %s4947_s6 = inlined_call_operand.vmem [shape: f32[2,1,32], index: 6, kind: input, shape index: {}]   ;;  %s4948_s7 = inlined_call_operand.vmem [shape: f32[2,1,32], index: 7, kind: input, shape index: {}]   ;;  %s4949_s8 = inlined_call_operand.vmem [shape: bf16[2,3,32,48], index: 8, kind: input, shape index: {}]   ;;  %s4950_s9 = inlined_call_operand.hbm [shape: f32[2,1,48], index: 9, kind: input, shape index: {}]   ;;  %s4951_s10 = inlined_call_operand.vmem [shape: bf16[2,3,48,32], index: 10, kind: input, shape index: {}]   ;;  %s4952_s11 = inlined_call_operand.hbm [shape: f32[2,1,32], index: 11, kind: input, shape index: {}]   ;;  %s4953_s12 = inlined_call_operand.hbm [shape: f32[2,1,32], index: 12, kind: input, shape index: {}]   ;;  %s4954_s13 = inlined_call_operand.hbm [shape: f32[2,1,32], index: 13, kind: input, shape index: {}]   ;;  %s4955_s14 = inlined_call_operand.vmem [shape: bf16[3,32,24], index: 14, kind: input, shape index: {}]   ;;  %s4956_s15 = inlined_call_operand.vmem [shape: f32[1,24], index: 15, kind: input, shape index: {}]   ;;  %s4957_s16 = inlined_call_operand.vmem [shape: f32[1,24], index: 16, kind: input, shape index: {}]   ;;  %s4958_s17 = inlined_call_operand.vmem [shape: f32[1,24], index: 17, kind: input, shape index: {}]   ;;  %s4959_s18 = inlined_call_operand.vmem [shape: bf16[3,24,32], index: 18, kind: input, shape index: {}]   ;;  %s4960_s19 = inlined_call_operand.vmem [shape: f32[1,32], index: 19, kind: input, shape index: {}]   ;;  %s4961_s20 = inlined_call_operand.vmem [shape: f32[1,32], index: 20, kind: input, shape index: {}]   ;;  %s4962_s21 = inlined_call_operand.vmem [shape: f32[1,32], index: 21, kind: input, shape index: {}]   ;;  %s4963_s22 = inlined_call_operand.vmem [shape: bf16[32,128], index: 22, kind: input, shape index: {}]   ;;  %s4964_s23 = inlined_call_operand.vmem [shape: f32[1,128], index: 23, kind: input, shape index: {}]   ;;  %s4965_s24 = inlined_call_operand.hbm [shape: f32[2,8,32], index: 24, kind: output, shape index: {0}]   ;;  %s4966_s25 = inlined_call_operand.hbm [shape: f32[2,8,128], index: 25, kind: output, shape index: {1}]  }
   0x1   :  { %4983 = sst [smem:[#allocation26_spill]] %s4941_s0 }
   0x2   :  { %4984 = sst [smem:[#allocation27_spill]] %s4942_s1 }
   0x3   :  { %4985 = sst [smem:[#allocation28_spill]] %s4943_s2 }
   0x4   :  { %4986 = sst [smem:[#allocation29_spill]] %s4944_s3 }
   0x5   :  { %4987 = sst [smem:[#allocation30_spill]] %s4945_s4 }
   0x6   :  { %4988 = sst [smem:[#allocation31_spill]] %s4946_s5 }
   0x7   :  { %4989 = sst [smem:[#allocation32_spill]] %s4947_s6 }
   0x8   :  { %4990 = sst [smem:[#allocation33_spill]] %s4948_s7 }
   0x9   :  { %4991 = sst [smem:[#allocation34_spill]] %s4949_s8 }
   0xa   :  { %4992 = sst [smem:[#allocation35_spill]] %s4950_s9 }
   0xb   :  { %4993 = sst [smem:[#allocation36_spill]] %s4952_s11 }
   0xc   :  { %4994 = sst [smem:[#allocation37_spill]] %s4953_s12 }
   0xd   :  { %4995 = sst [smem:[#allocation38_spill]] %s4954_s13 }
   0xe   :  { %4996 = sst [smem:[#allocation39_spill]] %s4958_s17 }
   0xf   :  { %4997 = sst [smem:[#allocation40_spill]] %s4960_s19 }
  0x10   :  { %4998 = sst [smem:[#allocation41_spill]] %s4961_s20 }
  0x11   :  { %4999 = sst [smem:[#allocation42_spill]] %s4962_s21 }
  0x12   :  { %5000 = sst [smem:[#allocation43_spill]] %s4963_s22 }
  0x13   :  { %5001 = sst [smem:[#allocation44_spill]] %s4964_s23 }
  0x14   :  { %5002 = sst [smem:[#allocation45_spill]] %s4965_s24 }
  0x15   :  { %5003 = sst [smem:[#allocation46_spill]] %s4966_s25 }
  0x16   :  { %31 = vsyncpa [#allocation4], 0 }
  0x17   :  { %33 = vsyncpa [#allocation4 + $0x1], 0 }
  0x18   :  { %34 = vsyncpa [#allocation7], 0 }
  0x19   :  { %36 = vsyncpa [#allocation7 + $0x1], 0 }
  0x1a   :  { %37 = vsyncpa [#allocation10], 0 }
  0x1b   :  { %39 = vsyncpa [#allocation10 + $0x1], 0 }
  0x1c   :  { %40 = vsyncpa [#allocation5], 0 }
  0x1d   :  { %41 = vsyncpa [#allocation13], 0  ;;  %s4209_s29 = smov 0   ;;  %s4211_s2 = smov 0  }
  0x1e   :  { %s4213_s6 = smov 0   ;;  %s4215_s30 = smov 0  }
  0x1f   :  { %s4217_s7 = smov 0   ;;  %s4219_s3 = smov 0  }
  0x20 LB: > { %5004 = sst [smem:[#allocation19_spill]] %s4044_s2  ;;  %s4238_s26 = sadd.s32 4294967295, %s4060_s3   ;;  %s4060_s3 = sphi %s4219_s3, %s47_s3   ;;  %s4056_s7 = sphi %s4217_s7, %s5060_s7   ;;  %s4052_s30 = sphi %s4215_s30, %s5059_s30   ;;  %s4048_s6 = sphi %s4213_s6, %s5058_s6   ;;  %s4044_s2 = sphi %s4211_s2, %s5057_s2   ;;  %s4040_s29 = sphi %s4209_s29, %s5056_s29  }
  0x21   : > { %5005 = sst [smem:[#allocation20_spill]] %s4048_s6  ;;  %s56_s1 = sadd.s32 1, %s4056_s7 }
  0x22   : > { %5006 = sst [smem:[#allocation21_spill]] %s4056_s7  ;;  %p57_p0 = scmp.ge.s32.totalorder %s56_s1, 2 }
  0x23   : > { %5007 = sst [smem:[#allocation22_spill]] %s4060_s3  ;;  %s295_s8 = sadd.s32 1, %s4048_s6 }
  0x24   : > { %5008 = sst [smem:[#allocation23_spill]] %s4238_s26  ;;  %p302_p1 = scmp.ne.s32.totalorder %s4048_s6, %s4044_s2 }
  0x25   : > { %p303_p2 = scmp.eq.s32.totalorder %s4060_s3, 0  ;;  %s5062_s1 = smov (%p57_p0, %s56_s1), 0 }
  0x26   : > { %5009 = sst [smem:[#allocation24_spill]] %s5062_s1  ;;  %p308_p4 = scmp.ne.s32.totalorder %s4044_s2, %s4040_s29 }
  0x27   : > { %p304_p3 = por %p303_p2, %p302_p1  ;;  %s292_s27 = ssub.s32 %s4056_s7, %s5062_s1 }
  0x28   : > { %p309_p5 = scmp.eq.s32.totalorder %s4238_s26, 0  ;;  %p293_p6 = scmp.eq.s32.totalorder %s292_s27, 0 }
  0x29   : > { %p3691_p8 = scmp.lt.s32.totalorder %s4060_s3, 2  ;;  %s4260_s9 = sand.u32 1, %s4048_s6  }
  0x2a   : > { %p4251_p7 = por %p309_p5, %p308_p4  ;;  %s4263_s5 = sshll.u32 %s4056_s7, 4 }
  0x2b   : > { %s4257_s28 = scalar_select %p293_p6, %s4048_s6, %s295_s8  }
  0x2c   : > { %s5010_s4 = scalar_select %p4251_p7, 1, 0 }
  0x2d   : > { %5011 = sst [smem:[#allocation25_spill]] %s4257_s28  ;;  %p4265_p9 = pnand %p3691_p8, %p304_p3 }
  0x2e   : > { %s813_s29 = sand.u32 1, %s4060_s3   ;;  %s5013_s11 = sld [smem:[#allocation36_spill]] }
  0x2f   : > { %s5012_s0 = scalar_select %p4265_p9, 1, 0 }
  0x30   : > { %s816_s8 = scalar_lea.vmem [#allocation6], %s4260_s9  ;;  %s4281_s7 = scalar_lea.sflag [#allocation7], %s813_s29 }
  0x31   : > { %s823_s28 = sshll.u32 %s816_s8, 4  ;;  %p4287_p13 = pneg %p4265_p9  ;;  %s4278_s28 = int_to_ptr.vmem [resolvable:$true] %s823_s28 }
  0x34   : > { %s4274_s25 = scalar_lea.hbm %s5013_s11, %s4263_s5  ;;  %s3827_s8 = scalar_lea.hbm %s5013_s11, 32 }
  0x35   : > { %s3822_s6 = scalar_lea.hbm %s4274_s25, 16  ;;  %p3828_p2 = scmp.lt.u32.totalorder %s4274_s25, %s5013_s11 }
  0x36   : > { %p3823_p12 = scmp.ne.s32.totalorder %s4274_s25, %s3822_s6  ;;  %p3829_p3 = scmp.lt.u32.totalorder %s3827_s8, %s3822_s6 }
  0x37   : > { %p3831_p5 = scmp.lt.u32.totalorder %s3822_s6, %s4274_s25 }
  0x38   : > { %p3825_p0 = pnand %p4287_p13, %p3823_p12  ;;  %p3830_p4 = por %p3829_p3, %p3828_p2 }
  0x3a   : > { %p3826_p1 = pneg %p3825_p0  ;;  %p3832_p6 = por %p3831_p5, %p3830_p4 }
  0x3c   : > { %p3833_p8 = pnand %p3832_p6, %p3826_p1 }
  0x3e   : > { %3836 = shalt.err (!%p3833_p8)
}
  0x3f   : > { %s3837_s29 = scalar_lea.vmem %s4278_s28, 16  ;;  %s4062_s1 = smov [#allocation6]  }
  0x40   : > { %p3838_p12 = scmp.ne.s32.totalorder %s4278_s28, %s3837_s29  ;;  %s3842_s27 = sshll.u32 %s4062_s1, 4  ;;  %s3843_s27 = int_to_ptr.vmem [resolvable:$false] %s3842_s27 }
  0x41   : > { %s3844_s21 = scalar_lea.vmem %s3843_s27, 32  ;;  %p3845_p11 = scmp.lt.s32.totalorder %s4278_s28, %s3843_s27 }
  0x42   : > { %p3840_p0 = pnand %p3838_p12, %p4287_p13  ;;  %p3846_p7 = scmp.lt.s32.totalorder %s3844_s21, %s3837_s29 }
  0x44   : > { %p3841_p10 = pneg %p3840_p0  ;;  %p3847_p2 = por %p3846_p7, %p3845_p11 }
  0x46   : > { %p3848_p3 = pnand %p3847_p2, %p3841_p10 }
  0x48   : > { %3851 = shalt.err (!%p3848_p3)
}
  0x49   : > { %3684 = dma.hbm_to_vmem [thread:$0]  (!%p4265_p9), %s4274_s25, 16, %s4278_s28, %s4281_s7  }
  0x4a   : > { %p5015_p1 = scmp.lt.s32.totalorder %s4060_s3, 3  ;;  %p5016_p4 = scmp.ge.s32.totalorder %s4060_s3, 1 }
  0x4b   : > { %s5018_s29 = sld [smem:[#allocation35_spill]]  ;;  %s791_s21 = scalar_lea.vmem [#allocation3], %s4260_s9 }
  0x4c   : > { %p4315_p5 = pnand %p5016_p4, %p5015_p1  ;;  %s798_s11 = sshll.u32 %s791_s21, 4  ;;  %s4326_s11 = int_to_ptr.vmem [resolvable:$true] %s798_s11 }
  0x4d   : > { %s5020_s12 = sld [smem:[#allocation37_spill]]  ;;  %s789_s20 = scalar_lea.sflag [#allocation4], %s4260_s9 }
  0x4e   : > { %s5017_s23 = scalar_select %p4315_p5, 1, 0 }
  0x51   : > { %s5019_s1 = smov %s5018_s29  ;;  %s4323_s27 = scalar_lea.hbm %s5018_s29, %s4263_s5 }
  0x52   : > { %s3852_s22 = scalar_lea.hbm %s4323_s27, 16  ;;  %s3857_s29 = scalar_lea.hbm %s5019_s1, 32 }
  0x53   : > { %s4332_s3 = scalar_lea.hbm %s5020_s12, %s4263_s5  ;;  %p3853_p7 = scmp.ne.s32.totalorder %s4323_s27, %s3852_s22 }
  0x54   : > { %p3858_p6 = scmp.lt.u32.totalorder %s4323_s27, %s5019_s1  ;;  %p3859_p8 = scmp.lt.u32.totalorder %s3857_s29, %s3852_s22 }
  0x55   : > { %p3855_p10 = pnand %p3853_p7, %p4287_p13  ;;  %p3861_p0 = scmp.lt.u32.totalorder %s3852_s22, %s4323_s27 }
  0x56   : > { %p3860_p12 = por %p3859_p8, %p3858_p6 }
  0x57   : > { %p3856_p11 = pneg %p3855_p10 }
  0x58   : > { %p3862_p2 = por %p3861_p0, %p3860_p12 }
  0x5a   : > { %p3863_p3 = pnand %p3862_p2, %p3856_p11 }
  0x5c   : > { %3866 = shalt.err (!%p3863_p3)
}
  0x5d   : > { %s3867_s21 = scalar_lea.vmem %s4326_s11, 16  ;;  %s4063_s25 = smov [#allocation3]  }
  0x5e   : > { %p3868_p1 = scmp.ne.s32.totalorder %s4326_s11, %s3867_s21  ;;  %s3872_s28 = sshll.u32 %s4063_s25, 4  ;;  %s3873_s28 = int_to_ptr.vmem [resolvable:$false] %s3872_s28 }
  0x5f   : > { %s3874_s17 = scalar_lea.vmem %s3873_s28, 32  ;;  %p3875_p10 = scmp.lt.s32.totalorder %s4326_s11, %s3873_s28 }
  0x60   : > { %p3870_p4 = pnand %p3868_p1, %p4287_p13  ;;  %p3876_p5 = scmp.lt.s32.totalorder %s3874_s17, %s3867_s21 }
  0x62   : > { %p3871_p7 = pneg %p3870_p4  ;;  %p3877_p6 = por %p3876_p5, %p3875_p10 }
  0x64   : > { %p3878_p8 = pnand %p3877_p6, %p3871_p7 }
  0x66   : > { %3881 = shalt.err (!%p3878_p8)
}
  0x67   : > { %3681 = dma.hbm_to_vmem [thread:$0]  (!%p4265_p9), %s4323_s27, 16, %s4326_s11, %s789_s20  }
  0x68   : > { %s833_s19 = scalar_lea.vmem [#allocation8], %s4260_s9  ;;  %s3882_s6 = scalar_lea.hbm %s4332_s3, 16 }
  0x69   : > { %s840_s22 = sshll.u32 %s833_s19, 4  ;;  %p3883_p11 = scmp.ne.s32.totalorder %s4332_s3, %s3882_s6  ;;  %s841_s22 = int_to_ptr.vmem [resolvable:$true] %s840_s22 }
  0x6a   : > { %s3887_s21 = scalar_lea.hbm %s5020_s12, 32  ;;  %p3888_p0 = scmp.lt.u32.totalorder %s4332_s3, %s5020_s12 }
  0x6b   : > { %p3885_p5 = pnand %p3883_p11, %p4287_p13  ;;  %p3889_p2 = scmp.lt.u32.totalorder %s3887_s21, %s3882_s6 }
  0x6c   : > { %p3891_p1 = scmp.lt.u32.totalorder %s3882_s6, %s4332_s3 }
  0x6d   : > { %p3886_p12 = pneg %p3885_p5  ;;  %p3890_p3 = por %p3889_p2, %p3888_p0 }
  0x6f   : > { %p3892_p4 = por %p3891_p1, %p3890_p3 }
  0x71   : > { %p3893_p7 = pnand %p3892_p4, %p3886_p12 }
  0x73   : > { %3896 = shalt.err (!%p3893_p7)
}
  0x74   : > { %s3897_s11 = scalar_lea.vmem %s841_s22, 16  ;;  %s4064_s20 = smov [#allocation8]  }
  0x75   : > { %p3898_p10 = scmp.ne.s32.totalorder %s841_s22, %s3897_s11  ;;  %s3902_s27 = sshll.u32 %s4064_s20, 4  ;;  %s3903_s27 = int_to_ptr.vmem [resolvable:$false] %s3902_s27 }
  0x76   : > { %s3904_s17 = scalar_lea.vmem %s3903_s27, 32  ;;  %p3905_p11 = scmp.lt.s32.totalorder %s841_s22, %s3903_s27 }
  0x77   : > { %p3900_p6 = pnand %p3898_p10, %p4287_p13  ;;  %p3906_p5 = scmp.lt.s32.totalorder %s3904_s17, %s3897_s11 }
  0x79   : > { %p3901_p8 = pneg %p3900_p6  ;;  %p3907_p9 = por %p3906_p5, %p3905_p11 }
  0x7b   : > { %p3908_p0 = pnand %p3907_p9, %p3901_p8 }
  0x7d   : > { %3911 = shalt.err (!%p3908_p0)
}
  0x7e   : > { %p5021_p2 = scmp.ne.s32.totalorder %s5012_s0, 0  ;;  %s5022_s13 = sld [smem:[#allocation38_spill]] }
  0x7f   : > { %s850_s29 = scalar_lea.vmem [#allocation9], %s4260_s9  ;;  %s848_s25 = scalar_lea.sflag [#allocation10], %s4260_s9 }
  0x80   : > { %3687 = dma.hbm_to_vmem [thread:$0]  (!%p5021_p2), %s4332_s3, 16, %s841_s22, %s4281_s7  }
  0x81   : > { %s857_s21 = sshll.u32 %s850_s29, 4  ;;  %s858_s21 = int_to_ptr.vmem [resolvable:$true] %s857_s21 }
  0x84   : > { %s4379_s8 = scalar_lea.hbm %s5022_s13, %s4263_s5  ;;  %s3917_s3 = scalar_lea.hbm %s5022_s13, 32 }
  0x85   : > { %s3912_s28 = scalar_lea.hbm %s4379_s8, 16  ;;  %p3918_p1 = scmp.lt.u32.totalorder %s4379_s8, %s5022_s13 }
  0x86   : > { %p3913_p9 = scmp.ne.s32.totalorder %s4379_s8, %s3912_s28  ;;  %p3919_p4 = scmp.lt.u32.totalorder %s3917_s3, %s3912_s28 }
  0x87   : > { %p3921_p10 = scmp.lt.u32.totalorder %s3912_s28, %s4379_s8 }
  0x88   : > { %p3915_p12 = pnand %p3913_p9, %p4287_p13  ;;  %p3920_p7 = por %p3919_p4, %p3918_p1 }
  0x8a   : > { %p3916_p3 = pneg %p3915_p12  ;;  %p3922_p6 = por %p3921_p10, %p3920_p7 }
  0x8c   : > { %p3923_p8 = pnand %p3922_p6, %p3916_p3 }
  0x8e   : > { %3926 = shalt.err (!%p3923_p8)
}
  0x8f   : > { %s3927_s9 = scalar_lea.vmem %s858_s21, 16  ;;  %s4065_s20 = smov [#allocation9]  }
  0x90   : > { %p3928_p11 = scmp.ne.s32.totalorder %s858_s21, %s3927_s9  ;;  %s3932_s27 = sshll.u32 %s4065_s20, 4  ;;  %s3933_s27 = int_to_ptr.vmem [resolvable:$false] %s3932_s27 }
  0x91   : > { %s3934_s17 = scalar_lea.vmem %s3933_s27, 32  ;;  %p3935_p9 = scmp.lt.s32.totalorder %s858_s21, %s3933_s27 }
  0x92   : > { %p3930_p5 = pnand %p3928_p11, %p4287_p13  ;;  %p3936_p12 = scmp.lt.s32.totalorder %s3934_s17, %s3927_s9 }
  0x94   : > { %p3931_p0 = pneg %p3930_p5  ;;  %p3937_p2 = por %p3936_p12, %p3935_p9 }
  0x96   : > { %p3938_p1 = pnand %p3937_p2, %p3931_p0 }
  0x98   : > { %3941 = shalt.err (!%p3938_p1)
}
  0x99   : > { %p5023_p4 = scmp.ne.s32.totalorder %s5012_s0, 0  ;;  %p5024_p3 = scmp.ne.s32.totalorder %s5017_s23, 0 }
  0x9a   : > { %s4403_s24 = sand.u32 (!%p5024_p3), 1, %s4044_s2   ;;  %p5025_p13 = scmp.ne.s32.totalorder (!%p5024_p3), %s5010_s4, 0 }
  0x9b   : > { %3690 = dma.hbm_to_vmem [thread:$0]  (!%p5023_p4), %s4379_s8, 16, %s858_s21, %s848_s25  }
  0x9c   : > { %866 = sbr.rel (%p5024_p3) target bundleno = 4215 (0x1077), region = 116  ;;  %s869_s19 = scalar_lea.sflag (!%p5024_p3), [#allocation4], %s4403_s24 }
  0xa3   : > { %4019 = dma.done.wait (%p5025_p13), %s869_s19, 16  }
  0xa4   : > { %4021 = vsyncadd (%p5025_p13), %s869_s19, 4294967280  ;;  %s876_s0 = sand.u32 1, %s4238_s26  }
  0xa5   : > { %s877_s8 = scalar_lea.sflag [#allocation7], %s876_s0 }
  0xa6   : > { %4023 = dma.done.wait (%p5025_p13), %s877_s8, 32  }
  0xa7   : > { %4025 = vsyncadd (%p5025_p13), %s877_s8, 4294967264  ;;  %s893_s21 = scalar_lea.sflag [#allocation10], %s4403_s24 }
  0xa8   : > { %4027 = dma.done.wait (%p5025_p13), %s893_s21, 16  }
  0xa9   : > { %4029 = vsyncadd (%p5025_p13), %s893_s21, 4294967280  ;;  %p1011_p2 = scmp.lt.s32.totalorder %s4052_s30, 1  ;;  %s5027_s20 = sld [smem:[#allocation28_spill]] }
  0xaa   : > { %s5028_s0 = sld [smem:[#allocation30_spill]]  ;;  %s5029_s29 = sld [smem:[#allocation31_spill]] }
  0xab   : > { %s4426_s28 = scalar_select %p1011_p2, %s4052_s30, 1 }
  0xac   : > { %s5030_s12 = sld [smem:[#allocation32_spill]]  ;;  %s5031_s3 = sld [smem:[#allocation33_spill]] }
  0xad   : > { %s3359_s11 = sshll.u32 %s4426_s28, 4  ;;  %s3660_s5 = smul.u32 48, %s4426_s28 }
  0xae   : > { %s3661_s9 = smul.u32 72, %s4426_s28  ;;  %s5032_s26 = sld [smem:[#allocation34_spill]] }
  0xaf   : > { %s1015_s27 = scalar_lea.vmem %s5027_s20, %s3359_s11  ;;  %p3243_p7 = scmp.ne.s32.totalorder %s4052_s30, 0 }
  0xb0   : > { %s4439_s8 = scalar_lea.vmem %s5028_s0, %s3359_s11  ;;  %s1026_s23 = scalar_lea.vmem %s5029_s29, %s4426_s28  ;;  %vm1055_vm0 = vcmask (!%p3243_p7), 261120  }
  0xb1   : > { %s4463_s25 = scalar_lea.vmem %s4951_s10, %s3661_s9  ;;  %1049 = sbr.rel (%p3243_p7) target bundleno = 190 (0xbe), region = 136 }
  0xb2   : > { %s1029_s13 = scalar_lea.vmem %s5030_s12, %s4426_s28  ;;  %s1032_s22 = scalar_lea.vmem %s5031_s3, %s4426_s28 }
  0xb3   : > { %s5033_s6 = sld [smem:[#allocation26_spill]] (!%p3243_p7)  ;;  %s5035_s21 = sld [smem:[#allocation27_spill]] (!%p3243_p7) }
  0xb4   : > { %s4458_s17 = scalar_lea.vmem %s5032_s26, %s3660_s5 }
  0xb9   : > { %s5034_s0 = smov %s5033_s6  ;;  %v1050_v0 = vld [vmem:[%s5033_s6] sm:$0xff] }
  0xba   : > { %v1052_v1 = vld [vmem:[%s5035_s21] sm:$0xff]  ;;  %v1051_v2 = vld [vmem:[%s5034_s0 + $0x8] sm:$0xff] }
  0xbb   : > { %v1053_v3 = vadd.f32 %v1052_v1, %v1050_v0  ;;  %v1054_v4 = vadd.f32 %v1052_v1, %v1051_v2 }
  0xbd   : > { %1056 = vst.msk [vmem:[#allocation2] sm:$0xff] %vm1055_vm0, %v1053_v3  ;;  %1057 = vst.msk [vmem:[#allocation2 + $0x8] sm:$0xff] %vm1055_vm0, %v1054_v4 }
  0xbe PF: > { %v3757_v5 = vld [vmem:[%s1015_s27] sm:$0xff]   ;;  %v4066_v6 = vmov 0.0   ;;  %v3758_v7 = vld [vmem:[%s1015_s27 + $0x8] sm:$0xff]   ;;  %vm4067_vm1 = vmmov 0   ;;  %vm1129_vm2 = vcmask 261120   ;;  %s5036_s3 = sld [smem:[#allocation29_spill]] }
  0xbf   : > { %3430 = vmatprep.subr.bf16.mxu1 %v4066_v6  ;;  %3444 = vmatprep.subr.bf16.mxu0 %v4066_v6  ;;  %s4068_s4 = smov 112   ;;  %s4069_s20 = smov 96   ;;  %vm1178_vm3 = vcmask 130048   ;;  %vm1225_vm4 = vcmask 64512   ;;  %vm1243_vm5 = vcmask 1043456   ;;  %v4535_v57 = vld [vmem:[%s4439_s8] sm:$0xff]  }
  0xc0   : > { %3431 = vmatpush3.bf16.msra.mxu1 %v3757_v5  ;;  %3434 = vmatprep.mubr.msk.bf16.mxu1 %vm4067_vm1, %v4066_v6  ;;  %s4070_s11 = smov 80   ;;  %s4071_s19 = smov 64   ;;  %v3760_v58 = vld [vmem:[%s4439_s8 + $0x8] sm:$0xff]   ;;  %vm2137_vm12 = vcmask 392192  }
  0xc1   : > { %3432 = vmatprep.subr.bf16.mxu1 %v4066_v6  ;;  %3446 = vmatprep.mubr.msk.bf16.mxu0 %vm4067_vm1, %v4066_v6  ;;  %s4072_s12 = smov 48   ;;  %p3310_p10 = scmp.ne.s32.totalorder %s4052_s30, 1 }
  0xc2   : > { %vm4074_vm13 = vmmov (!%p3310_p10), 0   ;;  %vm2596_vm14 = vcmask (!%p3310_p10), 195584   ;;  %s5048_s2 = sld [smem:[#allocation41_spill]] (!%p3310_p10)  ;;  %s5049_s7 = sld [smem:[#allocation42_spill]] (!%p3310_p10) }
  0xc4   : > { %v4479_v8 = vld [vmem:[#allocation2] sm:$0xff]  ;;  %v4481_v9 = vld [vmem:[#allocation2 + $0x8] sm:$0xff]  ;;  %3433 = vmatpush3.bf16.msra.mxu1 %v3758_v7  ;;  %s5037_s9 = scalar_lea.vmem %s5036_s3, %s4426_s28  ;;  %s5042_s28 = scalar_lea.vmem [#allocation6], %s4403_s24 }
  0xc5   : > { %v1110_v10 = vpack.c.bf16 %v4481_v9, %v4479_v8  ;;  %3438 = vmatprep.subr.bf16.mxu1 %v4066_v6  ;;  %v3264_v11 = vld [vmem:[%s5037_s9] ss:$0 sm:$0xff] }
  0xc7   : > { %3435 = vmatmul.mubr.msk.bf16.vlgmr.msra.gmra.mrb[0].mxu1 %vm1129_vm2, %v1110_v10 }
  0xc8   : > { %3440 = vmatprep.mubr.msk.bf16.mxu1 %vm4067_vm1, %v4066_v6 }
 0x19a   : > { %v1167_v12 = vpop.f32.mrb[0].mxu1 }
 0x19b   : > { %v1168_v13 = vadd.f32 %v3264_v11, %v1167_v12  ;;  %v3436_v14 = vpop.f32.mrb[1].mxu1 }
 0x19c   : > { %v1170_v15 = vpop.f32.mrb[2].mxu1 }
 0x19d   : > { %v1174_v16 = vpack.c.bf16 %v1168_v13, %v1168_v13  ;;  %v1171_v17 = vadd.f32 %v3264_v11, %v1170_v15  ;;  %v3437_v18 = vpop.f32.mrb[3].mxu1 }
 0x19f   : > { %1288 = vrot.lane.b32.xlu1 %v1174_v16, %s4068_s4  ;;  %1176 = vrot.lane.b32.xlu0 %v1174_v16, %s4069_s20  ;;  %v4515_v44 = vpack.c.bf16 %v1171_v17, %v1171_v17 }
 0x1a3   : > { %1290 = vrot.lane.b32.xlu0 %v1174_v16, %s4070_s11 }
 0x211   : > { %v1177_v19 = vpop.permute.xlu0 %1176  ;;  %v1289_v23 = vpop.permute.xlu1 %1288 }
 0x212   : > { %v1183_v20 = vsel %vm1178_vm3, %v1177_v19, 0 }
 0x213   : > { %3439 = vmatpush3.bf16.xpose.msra.mxu1 %v1183_v20 }
 0x214   : > { %3450 = vmatprep.subr.bf16.mxu1 %v4066_v6 }
 0x215   : > { %v1291_v21 = vpop.permute.xlu0 %1290 }
 0x216   : > { %v1296_v22 = vsel %vm1178_vm3, %v1291_v21, 0 }
 0x21a   : > { %3441 = vmatmul.mubr.msk.bf16.vlgmr.msra.gmra.mrb[4].mxu1 %vm1178_vm3, %v1174_v16 }
 0x21b   : > { %3451 = vmatpush3.bf16.xpose.msra.mxu1 %v1296_v22  ;;  %3452 = vmatprep.mubr.msk.bf16.mxu1 %vm4067_vm1, %v4066_v6 }
 0x21c   : > { %3462 = vmatprep.subr.bf16.mxu1 %v4066_v6 }
 0x222   : > { %3453 = vmatmul.mubr.msk.bf16.vlgmr.msra.gmra.mrb[8].mxu1 %vm1178_vm3, %v1289_v23 }
 0x223   : > { %3464 = vmatprep.mubr.msk.bf16.mxu1 %vm4067_vm1, %v4066_v6  ;;  %3463 = vmatpush3.bf16.msra.mxu1 %v3760_v58 }
 0x224   : > { %3474 = vmatprep.subr.bf16.mxu1 %v4066_v6 }
 0x2ed   : > { %v1219_v24 = vpop.f32.mrb[4].mxu1 }
 0x2ee   : > { %v3442_v25 = vpop.f32.mrb[5].mxu1  ;;  %v1226_v26 = vsel %vm1225_vm4, %v1219_v24, -inf }
 0x2ef   : > { %1227 = vmax.xlane.f32.xlu1 %v1226_v26  ;;  %v1222_v27 = vpop.f32.mrb[6].mxu1 }
 0x2f0   : > { %v3443_v28 = vpop.f32.mrb[7].mxu1 }
 0x2f5   : > { %v1332_v29 = vpop.f32.mrb[8].mxu1 }
 0x2f6   : > { %v3454_v30 = vpop.f32.mrb[9].mxu1  ;;  %v1338_v31 = vsel %vm1225_vm4, %v1332_v29, -inf }
 0x2f7   : > { %1339 = vmax.xlane.f32.xlu0 %v1338_v31  ;;  %v1335_v32 = vpop.f32.mrb[10].mxu1 }
 0x2f8   : > { %v3455_v33 = vpop.f32.mrb[11].mxu1  ;;  %v4568_v32 = vld [vmem:[%s1026_s23] ss:$0 sm:$0xff] }
 0x37c   : > { %v1228_v34 = vpop.xlane.xlu1 %1227 }
 0x37d   : > { %v1229_v35 = vsub.f32 %v1219_v24, %v1228_v34 }
 0x37f   : > { %v1230_v36 = vmul.f32 1.442695, %v1229_v35 }
 0x381   : > { %3776 = vpow2.f32 %v1230_v36 }
 0x384   : > { %v1340_v37 = vpop.xlane.xlu0 %1339 }
 0x385   : > { %v1341_v38 = vsub.f32 %v1332_v29, %v1340_v37 }
 0x387   : > { %v1342_v39 = vmul.f32 1.442695, %v1341_v38 }
 0x389   : > { %3778 = vpow2.f32 %v1342_v39 }
 0x38b   : > { %v3777_v40 = vpop.eup %3776 }
 0x38c   : > { %v1232_v41 = vsel %vm1225_vm4, %v3777_v40, 0.0 }
 0x38d   : > { %1233 = vadd.xlane.f32.xlu0 %v1232_v41 }
 0x393   : > { %v3779_v42 = vpop.eup %3778 }
 0x394   : > { %v1344_v43 = vsel %vm1225_vm4, %v3779_v42, 0.0 }
 0x395   : > { %1345 = vadd.xlane.f32.xlu1 %v1344_v43 }
 0x3a3   : > { %1238 = vrot.lane.b32.xlu0 %v1174_v16, %s4071_s19 }
 0x3a6   : > { %1350 = vrot.lane.b32.xlu1 %v1174_v16, %s4072_s12 }
 0x3a7   : > { %1610 = vrot.lane.b32.xlu0 %v4515_v44, %s4070_s11 }
 0x3aa   : > { %1499 = vrot.lane.b32.xlu1 %v4515_v44, %s4069_s20  ;;  %s5046_s20 = sld [smem:[#allocation40_spill]] (!%p3310_p10) }
 0x3ae   : > { %1608 = vrot.lane.b32.xlu1 %v4515_v44, %s4068_s4 }
 0x41a   : > { %v1234_v45 = vpop.xlane.xlu0 %1233 }
 0x41b   : > { %3780 = vrcp.f32 %v1234_v45 }
 0x41e   : > { %v1239_v46 = vpop.permute.xlu0 %1238 }
 0x41f   : > { %v1245_v47 = vsel %vm1243_vm5, %v1239_v46, 0 }
 0x420   : > { %3445 = vmatpush3.bf16.msra.mxu0 %v1245_v47 }
 0x421   : > { %3456 = vmatprep.subr.bf16.mxu0 %v4066_v6 }
 0x422   : > { %v1346_v48 = vpop.xlane.xlu1 %1345  ;;  %v1611_v10 = vpop.permute.xlu0 %1610 }
 0x423   : > { %3782 = vrcp.f32 %v1346_v48  ;;  %v1616_v11 = vsel %vm1178_vm3, %v1611_v10, 0 }
 0x425   : > { %v3781_v49 = vpop.eup %3780 }
 0x426   : > { %v1236_v50 = vmul.f32 %v3781_v49, %v3777_v40  ;;  %v1351_v51 = vpop.permute.xlu1 %1350 }
 0x427   : > { %v1356_v53 = vsel %vm1243_vm5, %v1351_v51, 0 }
 0x428   : > { %v1237_v52 = vpack.c.bf16 %v1236_v50, %v1236_v50 }
 0x42a   : > { %3447 = vmatmul.mubr.msk.bf16.vlgmr.msra.gmra.mrb[0].mxu0 %vm1225_vm4, %v1237_v52  ;;  %v1500_v0 = vpop.permute.xlu1 %1499 }
 0x42b   : > { %3457 = vmatpush3.bf16.msra.mxu0 %v1356_v53  ;;  %3458 = vmatprep.mubr.msk.bf16.mxu0 %vm4067_vm1, %v4066_v6  ;;  %v1505_v5 = vsel %vm1178_vm3, %v1500_v0, 0 }
 0x42c   : > { %3468 = vmatprep.subr.bf16.mxu0 %v4066_v6 }
 0x42d   : > { %v3783_v54 = vpop.eup %3782 }
 0x42e   : > { %v1348_v55 = vmul.f32 %v3783_v54, %v3779_v42  ;;  %v1609_v12 = vpop.permute.xlu1 %1608 }
 0x430   : > { %v1349_v56 = vpack.c.bf16 %v1348_v55, %v1348_v55 }
 0x432   : > { %3459 = vmatmul.mubr.msk.bf16.vlgmr.msra.gmra.mrb[4].mxu0 %vm1225_vm4, %v1349_v56 }
 0x433   : > { %3470 = vmatprep.mubr.msk.bf16.mxu0 %vm4067_vm1, %v4066_v6  ;;  %3469 = vmatpush3.bf16.msra.mxu0 %v4535_v57 }
 0x434   : > { %3480 = vmatprep.subr.bf16.mxu0 %v4066_v6 }
 0x4fd   : > { %v1281_v59 = vpop.f32.mrb[0].mxu0 }
 0x4fe   : > { %v1287_v60 = vpack.c.bf16 %v1281_v59, %v1281_v59  ;;  %v3448_v61 = vpop.f32.mrb[1].mxu0 }
 0x4ff   : > { %v1284_v62 = vpop.f32.mrb[2].mxu0 }
 0x500   : > { %v3449_v63 = vpop.f32.mrb[3].mxu0  ;;  %3471 = vmatmul.mubr.msk.bf16.vlgmr.msra.gmra.mrb[8].mxu0 %vm1178_vm3, %v1287_v60 }
 0x501   : > { %3482 = vmatprep.mubr.msk.bf16.mxu0 %vm4067_vm1, %v4066_v6 }
 0x505   : > { %v1392_v1 = vpop.f32.mrb[4].mxu0 }
 0x506   : > { %v1398_v2 = vpack.c.bf16 %v1392_v1, %v1392_v1  ;;  %v3460_v3 = vpop.f32.mrb[5].mxu0 }
 0x507   : > { %v1395_v4 = vpop.f32.mrb[6].mxu0 }
 0x508   : > { %v3461_v7 = vpop.f32.mrb[7].mxu0  ;;  %3465 = vmatmul.mubr.msk.bf16.vlgmr.msra.gmra.mrb[12].mxu1 %vm1178_vm3, %v1398_v2 }
 0x509   : > { %3475 = vmatpush3.bf16.xpose.msra.mxu1 %v1505_v5  ;;  %3476 = vmatprep.mubr.msk.bf16.mxu1 %vm4067_vm1, %v4066_v6 }
 0x50a   : > { %3486 = vmatprep.subr.bf16.mxu1 %v4066_v6 }
 0x510   : > { %3477 = vmatmul.mubr.msk.bf16.vlgmr.msra.gmra.mrb[16].mxu1 %vm1178_vm3, %v4515_v44 }
 0x511   : > { %3487 = vmatpush3.bf16.xpose.msra.mxu1 %v1616_v11  ;;  %3488 = vmatprep.mubr.msk.bf16.mxu1 %vm4067_vm1, %v4066_v6 }
 0x512   : > { %3498 = vmatprep.subr.bf16.mxu1 %v4066_v6 }
 0x518   : > { %3489 = vmatmul.mubr.msk.bf16.vlgmr.msra.gmra.mrb[20].mxu1 %vm1178_vm3, %v1609_v12 }
 0x519   : > { %3499 = vmatpush3.bf16.msra.mxu1 %v3760_v58  ;;  %3500 = vmatprep.mubr.msk.bf16.mxu1 %vm4067_vm1, %v4066_v6 }
 0x51a   : > { %3510 = vmatprep.subr.bf16.mxu1 %v4066_v6 }
 0x5d3   : > { %v1491_v13 = vpop.f32.mrb[8].mxu0 }
 0x5d4   : > { %v3472_v14 = vpop.f32.mrb[9].mxu0 }
 0x5d5   : > { %v1494_v15 = vpop.f32.mrb[10].mxu0 }
 0x5d6   : > { %v3473_v16 = vpop.f32.mrb[11].mxu0 }
 0x5db   : > { %v1442_v17 = vpop.f32.mrb[12].mxu1 }
 0x5dc   : > { %v1492_v18 = vadd.f32 %v1491_v13, %v1442_v17  ;;  %v3466_v19 = vpop.f32.mrb[13].mxu1 }
 0x5dd   : > { %v1445_v20 = vpop.f32.mrb[14].mxu1 }
 0x5de   : > { %v3467_v21 = vpop.f32.mrb[15].mxu1  ;;  %v1811_v33 = vadd.f32 %v4568_v32, %v1492_v18 }
 0x5e0   : > { %v4572_v34 = vadd.f32 %v1811_v33, %v4479_v8 }
 0x5e2   : > { %v1815_v35 = vsel %vm1129_vm2, %v4572_v34, 0.0  ;;  %v1824_v36 = vmul.f32 %v4572_v34, %v4572_v34 }
 0x5e3   : > { %v1541_v22 = vpop.f32.mrb[16].mxu1 }
 0x5e4   : > { %v3478_v23 = vpop.f32.mrb[17].mxu1  ;;  %v1547_v24 = vsel %vm1225_vm4, %v1541_v22, -inf  ;;  %v1826_v37 = vsel %vm1129_vm2, %v1824_v36, 0.0 }
 0x5e5   : > { %1548 = vmax.xlane.f32.xlu0 %v1547_v24  ;;  %v1544_v25 = vpop.f32.mrb[18].mxu1  ;;  %v3762_v23 = vld [vmem:[%s4458_s17 + $0x18] sm:$0xff]  }
 0x5e6   : > { %v3479_v26 = vpop.f32.mrb[19].mxu1  ;;  %v3767_v24 = vld [vmem:[%s4463_s25 + $0x18] sm:$0xff]  }
 0x5eb   : > { %v1652_v27 = vpop.f32.mrb[20].mxu1 }
 0x5ec   : > { %v3490_v28 = vpop.f32.mrb[21].mxu1  ;;  %v1658_v29 = vsel %vm1225_vm4, %v1652_v27, -inf }
 0x5ed   : > { %1659 = vmax.xlane.f32.xlu1 %v1658_v29  ;;  %v1655_v30 = vpop.f32.mrb[22].mxu1 }
 0x5ee   : > { %v3491_v31 = vpop.f32.mrb[23].mxu1 }
 0x5fe   : > { %1559 = vrot.lane.b32.xlu1 %v4515_v44, %s4071_s19 }
 0x622   : > { %1816 = vadd.xlane.f32.xlu1 %v1815_v35 }
 0x626   : > { %1827 = vadd.xlane.f32.xlu1 %v1826_v37 }
 0x672   : > { %v1549_v38 = vpop.xlane.xlu0 %1548 }
 0x673   : > { %v1550_v39 = vsub.f32 %v1541_v22, %v1549_v38  ;;  %v3761_v22 = vld [vmem:[%s4458_s17 + $0x10] sm:$0xff]  }
 0x675   : > { %v1551_v40 = vmul.f32 1.442695, %v1550_v39 }
 0x677   : > { %3784 = vpow2.f32 %v1551_v40 }
 0x67a   : > { %v1660_v41 = vpop.xlane.xlu1 %1659 }
 0x67b   : > { %v1661_v42 = vsub.f32 %v1652_v27, %v1660_v41  ;;  %v1927_v41 = vlaneseq }
 0x67d   : > { %v1662_v43 = vmul.f32 1.442695, %v1661_v42 }
 0x67e   : > { %v1560_v45 = vpop.permute.xlu1 %1559 }
 0x67f   : > { %3786 = vpow2.f32 %v1662_v43  ;;  %v1565_v8 = vsel %vm1243_vm5, %v1560_v45, 0 }
 0x680   : > { %3481 = vmatpush3.bf16.msra.mxu0 %v1565_v8  ;;  %v4612_v8 = vshrl.u32 %v1927_v41, 7 }
 0x681   : > { %v3785_v46 = vpop.eup %3784  ;;  %3492 = vmatprep.subr.bf16.mxu0 %v4066_v6 }
 0x682   : > { %v1553_v47 = vsel %vm1225_vm4, %v3785_v46, 0.0  ;;  %vm1956_vm6 = vcmp.lt.s32.totalorder %v4612_v8, 1  ;;  %vm2034_vm9 = vcmp.lt.s32.totalorder %v4612_v8, 7 }
 0x683   : > { %1554 = vadd.xlane.f32.xlu0 %v1553_v47 }
 0x689   : > { %v3787_v48 = vpop.eup %3786 }
 0x68a   : > { %v1664_v49 = vsel %vm1225_vm4, %v3787_v48, 0.0 }
 0x68b   : > { %1665 = vadd.xlane.f32.xlu0 %v1664_v49 }
 0x6a1   : > { %1670 = vrot.lane.b32.xlu0 %v4515_v44, %s4072_s12  ;;  %s5047_s12 = sld [smem:[#allocation43_spill]] (!%p3310_p10) }
 0x710   : > { %v1555_v50 = vpop.xlane.xlu0 %1554 }
 0x711   : > { %3788 = vrcp.f32 %v1555_v50 }
 0x718   : > { %v1666_v51 = vpop.xlane.xlu0 %1665 }
 0x719   : > { %3790 = vrcp.f32 %v1666_v51  ;;  %v1929_v51 = vadd.s32 8, %v4612_v8 }
 0x71b   : > { %v3789_v52 = vpop.eup %3788 }
 0x71c   : > { %v1557_v53 = vmul.f32 %v3789_v52, %v3785_v46  ;;  %v1671_v54 = vpop.permute.xlu0 %1670  ;;  %v3283_v46 = vld [vmem:[%s1029_s13] ss:$0 sm:$0xff]  ;;  %s5041_s13 = scalar_lea.vmem [#allocation3], %s4403_s24 }
 0x71d   : > { %v1676_v56 = vsel %vm1243_vm5, %v1671_v54, 0 }
 0x71e   : > { %v1558_v55 = vpack.c.bf16 %v1557_v53, %v1557_v53 }
 0x720   : > { %3483 = vmatmul.mubr.msk.bf16.vlgmr.msra.gmra.mrb[12].mxu0 %vm1225_vm4, %v1558_v55  ;;  %v1934_v55 = vand.u32 7, %v4612_v8 }
 0x721   : > { %3493 = vmatpush3.bf16.msra.mxu0 %v1676_v56  ;;  %3494 = vmatprep.mubr.msk.bf16.mxu0 %vm4067_vm1, %v4066_v6  ;;  %v1941_v56 = vand.u32 7, %v1929_v51  ;;  %v3295_v51 = vld [vmem:[%s5042_s28] ss:$0 sm:$0xff]  ;;  %s5045_s28 = sld [smem:[#allocation39_spill]] (!%p3310_p10) }
 0x722   : > { %3504 = vmatprep.subr.bf16.mxu0 %v4066_v6 }
 0x723   : > { %v3791_v58 = vpop.eup %3790 }
 0x724   : > { %v1668_v44 = vmul.f32 %v3791_v58, %v3787_v48  ;;  %v3763_v58 = vld [vmem:[%s4458_s17] sm:$0xff]  }
 0x726   : > { %v1669_v59 = vpack.c.bf16 %v1668_v44, %v1668_v44 }
 0x728   : > { %3495 = vmatmul.mubr.msk.bf16.vlgmr.msra.gmra.mrb[16].mxu0 %vm1225_vm4, %v1669_v59 }
 0x729   : > { %3505 = vmatpush3.bf16.msra.mxu0 %v4535_v57  ;;  %3506 = vmatprep.mubr.msk.bf16.mxu0 %vm4067_vm1, %v4066_v6 }
 0x72a   : > { %3534 = vmatprep.subr.bf16.mxu0 %v4066_v6 }
 0x7f3   : > { %v1601_v60 = vpop.f32.mrb[12].mxu0 }
 0x7f4   : > { %v1607_v61 = vpack.c.bf16 %v1601_v60, %v1601_v60  ;;  %v3484_v62 = vpop.f32.mrb[13].mxu0  ;;  %v4635_v60 = vadd.s32 4294967295, %v1934_v55 }
 0x7f5   : > { %v1604_v63 = vpop.f32.mrb[14].mxu0  ;;  %v3764_v62 = vld [vmem:[%s4458_s17 + $0x8] sm:$0xff]  }
 0x7f6   : > { %v3485_v0 = vpop.f32.mrb[15].mxu0  ;;  %3507 = vmatmul.mubr.msk.bf16.vlgmr.msra.gmra.mrb[20].mxu0 %vm1178_vm3, %v1607_v61  ;;  %v4637_v61 = vadd.s32 4294967295, %v1941_v56  ;;  %vm1961_vm7 = vcmp.ge.s32.totalorder %v4635_v60, 0 }
 0x7f7   : > { %3540 = vmatprep.mubr.msk.bf16.mxu0 %vm4067_vm1, %v4066_v6  ;;  %3535 = vmatpush3.bf16.msra.mxu0 %v3767_v24 }
 0x7f8   : > { %3536 = vmatprep.subr.bf16.mxu0 %v4066_v6  ;;  %vm1962_vm8 = vcmp.ge.s32.totalorder %v4637_v61, 0 }
 0x7fb   : > { %v1712_v1 = vpop.f32.mrb[16].mxu0 }
 0x7fc   : > { %v1718_v2 = vpack.c.bf16 %v1712_v1, %v1712_v1  ;;  %v3496_v3 = vpop.f32.mrb[17].mxu0 }
 0x7fd   : > { %v1715_v4 = vpop.f32.mrb[18].mxu0 }
 0x7fe   : > { %v3497_v57 = vpop.f32.mrb[19].mxu0  ;;  %3501 = vmatmul.mubr.msk.bf16.vlgmr.msra.gmra.mrb[24].mxu1 %vm1178_vm3, %v1718_v2  ;;  %v3765_v4 = vld [vmem:[%s4458_s17 + $0x20] sm:$0xff]  }
 0x7ff   : > { %3514 = vmatprep.mubr.msk.bf16.mxu1 %vm4067_vm1, %v4066_v6  ;;  %3511 = vmatpush3.bf16.msra.mxu1 %v3761_v22 }
 0x800   : > { %3512 = vmatprep.subr.bf16.mxu1 %v4066_v6 }
 0x803   : > { %3513 = vmatpush3.bf16.msra.mxu1 %v3762_v23 }
 0x804   : > { %3518 = vmatprep.subr.bf16.mxu1 %v4066_v6 }
 0x8c9   : > { %v1799_v5 = vpop.f32.mrb[20].mxu0 }
 0x8ca   : > { %v3508_v7 = vpop.f32.mrb[21].mxu0 }
 0x8cb   : > { %v1802_v10 = vpop.f32.mrb[22].mxu0  ;;  %v4659_v7 = vadd.s32 1, %v1934_v55 }
 0x8cc   : > { %v3509_v11 = vpop.f32.mrb[23].mxu0  ;;  %v4661_v10 = vadd.s32 1, %v1941_v56 }
 0x8cd   : > { %v3766_v11 = vld [vmem:[%s4458_s17 + $0x28] sm:$0xff]   ;;  %vm2041_vm10 = vcmp.lt.s32.totalorder %v4659_v7, 8  ;;  %s5044_s17 = scalar_lea.vmem [#allocation9], %s4403_s24 }
 0x8ce   : > { %vm2042_vm11 = vcmp.lt.s32.totalorder %v4661_v10, 8 }
 0x8d1   : > { %v1756_v12 = vpop.f32.mrb[24].mxu1 }
 0x8d2   : > { %v1800_v13 = vadd.f32 %v1799_v5, %v1756_v12  ;;  %v3502_v14 = vpop.f32.mrb[25].mxu1 }
 0x8d3   : > { %v1759_v15 = vpop.f32.mrb[26].mxu1 }
 0x8d4   : > { %v1812_v16 = vadd.f32 %v4568_v32, %v1800_v13  ;;  %v3503_v17 = vpop.f32.mrb[27].mxu1 }
 0x8d6   : > { %v1814_v18 = vadd.f32 %v1812_v16, %v4481_v9  ;;  %v1817_v9 = vpop.xlane.xlu1 %1816 }
 0x8d7   : > { %v1822_v26 = vmul.f32 0.03125, %v1817_v9 }
 0x8d8   : > { %v1818_v19 = vsel %vm1129_vm2, %v1814_v18, 0.0  ;;  %v1825_v20 = vmul.f32 %v1814_v18, %v1814_v18 }
 0x8d9   : > { %1819 = vadd.xlane.f32.xlu0 %v1818_v19  ;;  %v1834_v28 = vmul.f32 %v1822_v26, %v1822_v26  ;;  %v1840_v43 = vsub.f32 %v4572_v34, %v1822_v26  ;;  %v3284_v34 = vld [vmem:[%s1032_s22] ss:$0 sm:$0xff]  ;;  %v3769_v19 = vld [vmem:[%s4463_s25 + $0x28] sm:$0xff]   ;;  %s5043_s22 = scalar_lea.vmem [#allocation8], %s4403_s24 }
 0x8da   : > { %v1829_v21 = vsel %vm1129_vm2, %v1825_v20, 0.0  ;;  %v1828_v25 = vpop.xlane.xlu1 %1827  ;;  %v3285_v20 = vld [vmem:[%s5041_s13] ss:$0 sm:$0xff] }
 0x8db   : > { %v1832_v27 = vmul.f32 0.03125, %v1828_v25 }
 0x8dd   : > { %1830 = vadd.xlane.f32.xlu0 %v1829_v21  ;;  %v1836_v29 = vsub.f32 %v1832_v27, %v1834_v28 }
 0x8df   : > { %v1838_v30 = vmax.f32 %v1836_v29, 0.0  ;;  %v3770_v29 = vld [vmem:[%s4463_s25] sm:$0xff]  }
 0x8e1   : > { %v1842_v33 = vadd.f32 1e-05, %v1838_v30 }
 0x8e3   : > { %3792 = vrsqrt.f32 %v1842_v33 }
 0x8ed   : > { %v3793_v42 = vpop.eup %3792 }
 0x8ee   : > { %v1846_v45 = vmul.f32 %v3793_v42, %v1840_v43  ;;  %v3771_v43 = vld [vmem:[%s4463_s25 + $0x8] sm:$0xff]  }
 0x8f0   : > { %v1854_v49 = vmul.f32 %v3283_v46, %v1846_v45 }
 0x8f2   : > { %v4625_v53 = vadd.f32 %v3284_v34, %v1854_v49  ;;  %v3774_v49 = vld [vmem:[%s4463_s25 + $0x38] sm:$0xff]  }
 0x8f4   : > { %v1954_v63 = vrot.slane %v4625_v53, 7  ;;  %v2032_v12 = vrot.slane %v4625_v53, 1 }
 0x966   : > { %v1820_v31 = vpop.xlane.xlu0 %1819 }
 0x967   : > { %v1823_v32 = vmul.f32 0.03125, %v1820_v31 }
 0x969   : > { %v1835_v36 = vmul.f32 %v1823_v32, %v1823_v32  ;;  %v1841_v47 = vsub.f32 %v1814_v18, %v1823_v32  ;;  %v3768_v18 = vld [vmem:[%s4463_s25 + $0x20] sm:$0xff]  }
 0x96a   : > { %v1831_v35 = vpop.xlane.xlu0 %1830  ;;  %3537 = vmatpush3.bf16.msra.mxu0 %v3768_v18 }
 0x96b   : > { %v1833_v37 = vmul.f32 0.03125, %v1831_v35  ;;  %3538 = vmatprep.subr.bf16.mxu0 %v4066_v6 }
 0x96d   : > { %v1837_v38 = vsub.f32 %v1833_v37, %v1835_v36 }
 0x96e   : > { %3539 = vmatpush3.bf16.msra.mxu0 %v3769_v19 }
 0x96f   : > { %v1839_v39 = vmax.f32 %v1837_v38, 0.0  ;;  %3544 = vmatprep.subr.bf16.mxu0 %v4066_v6 }
 0x971   : > { %v1843_v40 = vadd.f32 1e-05, %v1839_v39 }
 0x973   : > { %3794 = vrsqrt.f32 %v1843_v40 }
 0x97d   : > { %v3795_v48 = vpop.eup %3794 }
 0x97e   : > { %v1847_v50 = vmul.f32 %v3795_v48, %v1841_v47  ;;  %v3772_v47 = vld [vmem:[%s4463_s25 + $0x10] sm:$0xff]  }
 0x97f   : > { %v3773_v48 = vld [vmem:[%s4463_s25 + $0x30] sm:$0xff]  }
 0x980   : > { %v1855_v52 = vmul.f32 %v3283_v46, %v1847_v50  ;;  %v3775_v50 = vld [vmem:[%s4463_s25 + $0x40] sm:$0xff]  }
 0x982   : > { %v4627_v54 = vadd.f32 %v3284_v34, %v1855_v52 }
 0x984   : > { %v1864_v44 = vpack.c.bf16 %v4627_v54, %v4625_v53  ;;  %v1955_v59 = vrot.slane %v4627_v54, 7  ;;  %v2033_v5 = vrot.slane %v4627_v54, 1 }
 0x986   : > { %3515 = vmatmul.mubr.msk.bf16.vlgmr.msra.gmra.mrb[28].mxu1 %vm1129_vm2, %v1864_v44  ;;  %v1957_v0 = vsel %vm1956_vm6, %v1954_v63, %v1955_v59  ;;  %v1958_v1 = vsel %vm1956_vm6, %v1955_v59, %v1954_v63  ;;  %v2035_v13 = vsel %vm2034_vm9, %v2032_v12, %v2033_v5  ;;  %v2036_v14 = vsel %vm2034_vm9, %v2033_v5, %v2032_v12 }
 0x987   : > { %3519 = vmatpush3.bf16.msra.mxu1 %v3763_v58  ;;  %3522 = vmatprep.mubr.msk.bf16.mxu1 %vm4067_vm1, %v4066_v6  ;;  %v1971_v2 = vsel %vm1961_vm7, %v1958_v1, 0.0  ;;  %v1972_v3 = vsel %vm1962_vm8, %v1957_v0, 0.0  ;;  %v2049_v15 = vsel %vm2041_vm10, %v2035_v13, 0.0  ;;  %v2050_v16 = vsel %vm2042_vm11, %v2036_v14, 0.0 }
 0x988   : > { %3520 = vmatprep.subr.bf16.mxu1 %v4066_v6  ;;  %v1973_v57 = vpack.c.bf16 %v1972_v3, %v1971_v2  ;;  %v2051_v17 = vpack.c.bf16 %v2050_v16, %v2049_v15 }
 0x98b   : > { %3521 = vmatpush3.bf16.msra.mxu1 %v3764_v62 }
 0x98c   : > { %3526 = vmatprep.subr.bf16.mxu1 %v4066_v6 }
 0x992   : > { %3523 = vmatmul.mubr.msk.bf16.vlgmr.msra.gmra.mrb[28].mxu1 %vm1129_vm2, %v1973_v57 }
 0x993   : > { %3527 = vmatpush3.bf16.msra.mxu1 %v3765_v4  ;;  %3530 = vmatprep.mubr.msk.bf16.mxu1 %vm4067_vm1, %v4066_v6 }
 0x994   : > { %3528 = vmatprep.subr.bf16.mxu1 %v4066_v6 }
 0x997   : > { %3529 = vmatpush3.bf16.msra.mxu1 %v3766_v11 }
 0x99e   : > { %3531 = vmatmul.mubr.msk.bf16.vlgmr.msra.gmra.mrb[28].mxu1 %vm1129_vm2, %v2051_v17 }
 0xa71   : > { %v2101_v21 = vpop.f32.mrb[28].mxu1 }
 0xa72   : > { %v3620_v22 = vadd.f32 %v3285_v20, %v2101_v21  ;;  %v3532_v23 = vpop.f32.mrb[29].mxu1 }
 0xa73   : > { %v2104_v24 = vpop.f32.mrb[30].mxu1 }
 0xa74   : > { %v2110_v9 = vmax.f32 %v3620_v22, 0.0  ;;  %v3621_v25 = vadd.f32 %v3285_v20, %v2104_v24  ;;  %v3533_v26 = vpop.f32.mrb[31].mxu1 }
 0xa76   : > { %v2111_v27 = vmax.f32 %v3621_v25, 0.0  ;;  %v2182_v28 = vrot.slane %v2110_v9, 7  ;;  %v2253_v30 = vrot.slane %v2110_v9, 1  ;;  %v3308_v25 = vld [vmem:[%s5043_s22] ss:$0 sm:$0xff] }
 0xa78   : > { %v2112_v31 = vpack.c.bf16 %v2111_v27, %v2110_v9  ;;  %v2183_v32 = vrot.slane %v2111_v27, 7  ;;  %v2254_v33 = vrot.slane %v2111_v27, 1 }
 0xa7a   : > { %v2184_v35 = vsel %vm1956_vm6, %v2182_v28, %v2183_v32  ;;  %v2185_v36 = vsel %vm1956_vm6, %v2183_v32, %v2182_v28  ;;  %v2255_v37 = vsel %vm2034_vm9, %v2253_v30, %v2254_v33  ;;  %v2256_v38 = vsel %vm2034_vm9, %v2254_v33, %v2253_v30  ;;  %3541 = vmatmul.mubr.msk.bf16.vlgmr.msra.gmra.mrb[24].mxu0 %vm2137_vm12, %v2112_v31 }
 0xa7b   : > { %v2186_v39 = vsel %vm1961_vm7, %v2185_v36, 0.0  ;;  %v2187_v40 = vsel %vm1962_vm8, %v2184_v35, 0.0  ;;  %v2257_v41 = vsel %vm2041_vm10, %v2255_v37, 0.0  ;;  %v2258_v42 = vsel %vm2042_vm11, %v2256_v38, 0.0  ;;  %3545 = vmatpush3.bf16.msra.mxu0 %v3770_v29  ;;  %3550 = vmatprep.mubr.msk.bf16.mxu0 %vm4067_vm1, %v4066_v6  ;;  %v3309_v29 = vld [vmem:[%s5044_s17] ss:$0 sm:$0xff] }
 0xa7c   : > { %3546 = vmatprep.subr.bf16.mxu0 %v4066_v6  ;;  %v2188_v45 = vpack.c.bf16 %v2187_v40, %v2186_v39  ;;  %v2259_v46 = vpack.c.bf16 %v2258_v42, %v2257_v41  ;;  %v3800_v36 = vld [vmem:[%s4955_s14 + $0x10] sm:$0xff] (!%p3310_p10)   ;;  %v4073_v37 = vmov (!%p3310_p10), 0.0   ;;  %v3801_v38 = vld [vmem:[%s4955_s14 + $0x18] sm:$0xff] (!%p3310_p10)   ;;  %v3802_v40 = vld [vmem:[%s4955_s14] sm:$0xff] (!%p3310_p10)  }
 0xa7d   : > { %3588 = vmatprep.subr.bf16.mxu1 (!%p3310_p10), %v4073_v37  ;;  %3592 = vmatprep.mubr.msk.bf16.mxu1 (!%p3310_p10), %vm4074_vm13, %v4073_v37 }
 0xa7f   : > { %3547 = vmatpush3.bf16.msra.mxu0 %v3771_v43  ;;  %v3803_v43 = vld [vmem:[%s4955_s14 + $0x8] sm:$0xff] (!%p3310_p10)  }
 0xa80   : > { %3548 = vmatprep.subr.bf16.mxu0 %v4066_v6 }
 0xa83   : > { %3549 = vmatpush3.bf16.msra.mxu0 %v3772_v47 }
 0xa84   : > { %3554 = vmatprep.subr.bf16.mxu0 %v4066_v6 }
 0xa86   : > { %3551 = vmatmul.mubr.msk.bf16.vlgmr.msra.gmra.mrb[24].mxu0 %vm2137_vm12, %v2188_v45 }
 0xa87   : > { %3555 = vmatpush3.bf16.msra.mxu0 %v3773_v48  ;;  %3560 = vmatprep.mubr.msk.bf16.mxu0 %vm4067_vm1, %v4066_v6 }
 0xa88   : > { %3556 = vmatprep.subr.bf16.mxu0 %v4066_v6 }
 0xa8b   : > { %3557 = vmatpush3.bf16.msra.mxu0 %v3774_v49 }
 0xa8c   : > { %3558 = vmatprep.subr.bf16.mxu0 %v4066_v6 }
 0xa8f   : > { %3559 = vmatpush3.bf16.msra.mxu0 %v3775_v50  ;;  %v3804_v50 = vld [vmem:[%s4955_s14 + $0x20] sm:$0xff] (!%p3310_p10)  }
 0xa90   : > { %3564 = vmatprep.subr.bf16.mxu0 (!%p3310_p10), %v4073_v37 }
 0xa92   : > { %3561 = vmatmul.mubr.msk.bf16.vlgmr.msra.gmra.mrb[24].mxu0 %vm2137_vm12, %v2259_v46 }
 0xa93   : > { %3565 = vmatpush3.bf16.msra.mxu0 (!%p3310_p10), %v3800_v36  ;;  %3568 = vmatprep.mubr.msk.bf16.mxu0 (!%p3310_p10), %vm4074_vm13, %v4073_v37  ;;  %v3329_v36 = vld [vmem:[%s4957_s16] ss:$0 sm:$0xff] (!%p3310_p10) }
 0xa94   : > { %3566 = vmatprep.subr.bf16.mxu0 (!%p3310_p10), %v4073_v37 }
 0xa97   : > { %3567 = vmatpush3.bf16.msra.mxu0 (!%p3310_p10), %v3801_v38 }
 0xa98   : > { %3572 = vmatprep.subr.bf16.mxu0 (!%p3310_p10), %v4073_v37 }
 0xb65   : > { %v2315_v34 = vpop.f32.mrb[24].mxu0 }
 0xb66   : > { %v3622_v52 = vadd.f32 %v3295_v51, %v2315_v34  ;;  %v3562_v55 = vpop.f32.mrb[25].mxu0 }
 0xb67   : > { %v2318_v56 = vpop.f32.mrb[26].mxu0 }
 0xb68   : > { %v2324_v58 = vmax.f32 %v3622_v52, 0.0  ;;  %v3623_v44 = vadd.f32 %v3295_v51, %v2318_v56  ;;  %v3563_v59 = vpop.f32.mrb[27].mxu0  ;;  %v3805_v52 = vld [vmem:[%s4955_s14 + $0x28] sm:$0xff] (!%p3310_p10)  }
 0xb6a   : > { %v2326_v62 = vadd.f32 %v2324_v58, %v4625_v53  ;;  %v2325_v63 = vmax.f32 %v3623_v44, 0.0 }
 0xb6c   : > { %v2327_v0 = vadd.f32 %v2325_v63, %v4627_v54  ;;  %v2328_v1 = vsel %vm1129_vm2, %v2326_v62, 0.0  ;;  %v2336_v6 = vmul.f32 %v2326_v62, %v2326_v62 }
 0xb6d   : > { %2329 = vadd.xlane.f32.xlu1 %v2328_v1 }
 0xb6e   : > { %v2331_v2 = vsel %vm1129_vm2, %v2327_v0, 0.0  ;;  %v2337_v3 = vmul.f32 %v2327_v0, %v2327_v0  ;;  %v2338_v4 = vsel %vm1129_vm2, %v2336_v6, 0.0 }
 0xb6f   : > { %2332 = vadd.xlane.f32.xlu0 %v2331_v2 }
 0xb70   : > { %v2341_v57 = vsel %vm1129_vm2, %v2337_v3, 0.0 }
 0xb71   : > { %2339 = vadd.xlane.f32.xlu1 %v2338_v4 }
 0xb73   : > { %2342 = vadd.xlane.f32.xlu0 %v2341_v57 }
 0xbfa   : > { %v2330_v5 = vpop.xlane.xlu1 %2329 }
 0xbfb   : > { %v2334_v11 = vmul.f32 0.03125, %v2330_v5 }
 0xbfc   : > { %v2333_v53 = vpop.xlane.xlu0 %2332 }
 0xbfd   : > { %v2335_v12 = vmul.f32 0.03125, %v2333_v53  ;;  %v2346_v54 = vmul.f32 %v2334_v11, %v2334_v11  ;;  %v2352_v24 = vsub.f32 %v2326_v62, %v2334_v11  ;;  %v3319_v62 = vld [vmem:[%s4956_s15] ss:$0 sm:$0xff] (!%p3310_p10) }
 0xbfe   : > { %v2340_v13 = vpop.xlane.xlu1 %2339 }
 0xbff   : > { %v2344_v14 = vmul.f32 0.03125, %v2340_v13  ;;  %v2347_v16 = vmul.f32 %v2335_v12, %v2335_v12  ;;  %v2353_v26 = vsub.f32 %v2327_v0, %v2335_v12 }
 0xc00   : > { %v2343_v15 = vpop.xlane.xlu0 %2342 }
 0xc01   : > { %v2348_v17 = vsub.f32 %v2344_v14, %v2346_v54  ;;  %v2345_v18 = vmul.f32 0.03125, %v2343_v15  ;;  %v3806_v14 = vld [vmem:[%s4959_s18 + $0xc] sm:$0xff] (!%p3310_p10)   ;;  %v3807_v15 = vld [vmem:[%s4959_s18 + $0x14] ss:$0 sps:$4 sm:$0xff] (!%p3310_p10)  }
 0xc02   : > { %3589 = vmatpush3.bf16.msra.mxu1 (!%p3310_p10), %v3806_v14 }
 0xc03   : > { %v2350_v19 = vmax.f32 %v2348_v17, 0.0  ;;  %v2349_v20 = vsub.f32 %v2345_v18, %v2347_v16  ;;  %3590 = vmatprep.subr.bf16.mxu1 (!%p3310_p10), %v4073_v37  ;;  %v2678_v16 = vsel (!%p3310_p10), %vm1243_vm5, %v3807_v15, 0 }
 0xc05   : > { %v2354_v21 = vadd.f32 1e-05, %v2350_v19  ;;  %v2351_v22 = vmax.f32 %v2349_v20, 0.0 }
 0xc06   : > { %3591 = vmatpush3.bf16.msra.mxu1 (!%p3310_p10), %v2678_v16 }
 0xc07   : > { %3796 = vrsqrt.f32 %v2354_v21  ;;  %v2355_v23 = vadd.f32 1e-05, %v2351_v22  ;;  %3596 = vmatprep.subr.bf16.mxu1 (!%p3310_p10), %v4073_v37 }
 0xc09   : > { %3798 = vrsqrt.f32 %v2355_v23 }
 0xc11   : > { %v3797_v9 = vpop.eup %3796 }
 0xc12   : > { %v2358_v27 = vmul.f32 %v3797_v9, %v2352_v24 }
 0xc13   : > { %v3799_v28 = vpop.eup %3798 }
 0xc14   : > { %v2366_v30 = vmul.f32 %v3308_v25, %v2358_v27  ;;  %v2359_v31 = vmul.f32 %v3799_v28, %v2353_v26  ;;  %2381 = sbr.rel (%p3310_p10) target bundleno = 4149 (0x1035), region = 140 }
 0xc16   : > { %v2374_v32 = vadd.f32 %v3309_v29, %v2366_v30  ;;  %v2367_v33 = vmul.f32 %v3308_v25, %v2359_v31 }
 0xc18   : > { %2376 = vst.msk [vmem:[#allocation2] sm:$0xff] %vm1129_vm2, %v2374_v32  ;;  %v2375_v35 = vadd.f32 %v3309_v29, %v2367_v33  ;;  %2382 = vst.msk [vmem:[#allocation11] sm:$0xff] (!%p3310_p10), %vm1129_vm2, %v2374_v32  ;;  %v2462_v41 = vrot.slane (!%p3310_p10), %v2374_v32, 7  ;;  %v2527_v51 = vrot.slane (!%p3310_p10), %v2374_v32, 1 }
 0xc1a   : > { %2377 = vst.msk [vmem:[#allocation2 + $0x8] sm:$0xff] %vm1129_vm2, %v2375_v35  ;;  %2383 = vst.msk [vmem:[#allocation11 + $0x8] sm:$0xff] (!%p3310_p10), %vm1129_vm2, %v2375_v35  ;;  %v2399_v39 = vpack.c.bf16 (!%p3310_p10), %v2375_v35, %v2374_v32  ;;  %v2463_v42 = vrot.slane (!%p3310_p10), %v2375_v35, 7  ;;  %v2528_v34 = vrot.slane (!%p3310_p10), %v2375_v35, 1 }
 0xc1c   : > { %3569 = vmatmul.mubr.msk.bf16.vlgmr.msra.gmra.mrb[0].mxu0 %vm1129_vm2, %v2399_v39  ;;  %v2464_v45 = vsel %vm1956_vm6, %v2462_v41, %v2463_v42  ;;  %v2465_v46 = vsel %vm1956_vm6, %v2463_v42, %v2462_v41  ;;  %v2529_v55 = vsel %vm2034_vm9, %v2527_v51, %v2528_v34  ;;  %v2530_v56 = vsel %vm2034_vm9, %v2528_v34, %v2527_v51  ;;  %v3330_v42 = vld [vmem:[%s5045_s28] ss:$0 sm:$0xff]  ;;  %s5050_s28 = sld [smem:[#allocation44_spill]] }
 0xc1d   : > { %3573 = vmatpush3.bf16.msra.mxu0 %v3802_v40  ;;  %3576 = vmatprep.mubr.msk.bf16.mxu0 %vm4074_vm13, %v4073_v37  ;;  %v2466_v47 = vsel %vm1961_vm7, %v2465_v46, 0.0  ;;  %v2467_v48 = vsel %vm1962_vm8, %v2464_v45, 0.0  ;;  %v2531_v58 = vsel %vm2041_vm10, %v2529_v55, 0.0  ;;  %v2532_v44 = vsel %vm2042_vm11, %v2530_v56, 0.0 }
 0xc1e   : > { %3574 = vmatprep.subr.bf16.mxu0 %v4073_v37  ;;  %v2468_v49 = vpack.c.bf16 %v2467_v48, %v2466_v47  ;;  %v2533_v59 = vpack.c.bf16 %v2532_v44, %v2531_v58  ;;  %v3808_v47 = vld [vmem:[%s4959_s18] sm:$0xff]   ;;  %v3810_v44 = vld [vmem:[%s4959_s18 + $0x18] sm:$0xff]  }
 0xc21   : > { %3575 = vmatpush3.bf16.msra.mxu0 %v3803_v43 }
 0xc22   : > { %3580 = vmatprep.subr.bf16.mxu0 %v4073_v37 }
 0xc28   : > { %3577 = vmatmul.mubr.msk.bf16.vlgmr.msra.gmra.mrb[0].mxu0 %vm1129_vm2, %v2468_v49  ;;  %v3809_v49 = vld [vmem:[%s4959_s18 + $0x8] ss:$0 sps:$4 sm:$0xff]  }
 0xc29   : > { %3581 = vmatpush3.bf16.msra.mxu0 %v3804_v50  ;;  %3584 = vmatprep.mubr.msk.bf16.mxu0 %vm4074_vm13, %v4073_v37  ;;  %v2741_v51 = vsel %vm1243_vm5, %v3809_v49, 0 }
 0xc2a   : > { %3582 = vmatprep.subr.bf16.mxu0 %v4073_v37 }
 0xc2d   : > { %3583 = vmatpush3.bf16.msra.mxu0 %v3805_v52 }
 0xc2e   : > { %3612 = vmatprep.subr.bf16.mxu0 %v4073_v37 }
 0xc34   : > { %3585 = vmatmul.mubr.msk.bf16.vlgmr.msra.gmra.mrb[0].mxu0 %vm1129_vm2, %v2533_v59 }
 0xc35   : > { %3616 = vmatprep.mubr.msk.bf16.mxu0 %vm4074_vm13, %v4073_v37 }
 0xd07   : > { %v2583_v63 = vpop.f32.mrb[0].mxu0 }
 0xd08   : > { %v3640_v0 = vadd.f32 %v3319_v62, %v2583_v63  ;;  %v3586_v1 = vpop.f32.mrb[1].mxu0 }
 0xd09   : > { %v2586_v6 = vpop.f32.mrb[2].mxu0 }
 0xd0a   : > { %v2592_v2 = vmax.f32 %v3640_v0, 0.0  ;;  %v3641_v3 = vadd.f32 %v3319_v62, %v2586_v6  ;;  %v3587_v4 = vpop.f32.mrb[3].mxu0  ;;  %v3811_v62 = vld [vmem:[%s4959_s18 + $0x20] ss:$0 sps:$4 sm:$0xff]  }
 0xd0b   : > { %v2806_v60 = vsel %vm1243_vm5, %v3811_v62, 0  ;;  %v3337_v4 = vld [vmem:[%s5046_s20] ss:$0 sm:$0xff] }
 0xd0c   : > { %v2593_v57 = vmax.f32 %v3641_v3, 0.0  ;;  %v2597_v5 = vsel %vm2596_vm14, %v2592_v2, 0.0  ;;  %v2606_v11 = vmul.f32 %v2592_v2, %v2592_v2 }
 0xd0d   : > { %2598 = vadd.xlane.f32.xlu0 %v2597_v5 }
 0xd0e   : > { %v2608_v53 = vsel %vm2596_vm14, %v2606_v11, 0.0  ;;  %v2607_v12 = vmul.f32 %v2593_v57, %v2593_v57  ;;  %v2600_v13 = vsel %vm2596_vm14, %v2593_v57, 0.0 }
 0xd0f   : > { %2609 = vadd.xlane.f32.xlu1 %v2608_v53 }
 0xd10   : > { %v2611_v54 = vsel %vm2596_vm14, %v2607_v12, 0.0 }
 0xd11   : > { %2601 = vadd.xlane.f32.xlu0 %v2600_v13 }
 0xd13   : > { %2612 = vadd.xlane.f32.xlu1 %v2611_v54 }
 0xd9a   : > { %v2599_v17 = vpop.xlane.xlu0 %2598 }
 0xd9b   : > { %v2604_v18 = vmul.f32 0.041666668, %v2599_v17 }
 0xd9c   : > { %v2610_v19 = vpop.xlane.xlu1 %2609 }
 0xd9d   : > { %v2616_v20 = vmul.f32 %v2604_v18, %v2604_v18  ;;  %v2614_v21 = vmul.f32 0.041666668, %v2610_v19  ;;  %v2622_v32 = vsub.f32 %v2592_v2, %v2604_v18  ;;  %v3812_v18 = vld [vmem:[%s5047_s12] sm:$0xff]   ;;  %v3813_v19 = vld [vmem:[%s5047_s12 + $0x8] sm:$0xff]  }
 0xd9e   : > { %v2602_v22 = vpop.xlane.xlu0 %2601  ;;  %3613 = vmatpush3.bf16.msra.mxu0 %v3812_v18 }
 0xd9f   : > { %v2618_v23 = vsub.f32 %v2614_v21, %v2616_v20  ;;  %v2605_v24 = vmul.f32 0.041666668, %v2602_v22  ;;  %3614 = vmatprep.subr.bf16.mxu0 %v4073_v37 }
 0xda0   : > { %v2613_v9 = vpop.xlane.xlu1 %2612 }
 0xda1   : > { %v2620_v25 = vmax.f32 %v2618_v23, 0.0  ;;  %v2617_v26 = vmul.f32 %v2605_v24, %v2605_v24  ;;  %v2615_v27 = vmul.f32 0.041666668, %v2613_v9  ;;  %v2623_v38 = vsub.f32 %v2593_v57, %v2605_v24 }
 0xda2   : > { %3615 = vmatpush3.bf16.msra.mxu0 %v3813_v19 }
 0xda3   : > { %v2624_v28 = vadd.f32 1e-05, %v2620_v25  ;;  %v2619_v29 = vsub.f32 %v2615_v27, %v2617_v26 }
 0xda5   : > { %3814 = vrsqrt.f32 %v2624_v28  ;;  %v2621_v30 = vmax.f32 %v2619_v29, 0.0 }
 0xda7   : > { %v2625_v31 = vadd.f32 1e-05, %v2621_v30 }
 0xda9   : > { %3816 = vrsqrt.f32 %v2625_v31 }
 0xdaf   : > { %v3815_v33 = vpop.eup %3814 }
 0xdb0   : > { %v2628_v35 = vmul.f32 %v3815_v33, %v2622_v32 }
 0xdb2   : > { %v2636_v41 = vmul.f32 %v3329_v36, %v2628_v35 }
 0xdb3   : > { %v3817_v39 = vpop.eup %3816 }
 0xdb4   : > { %v2629_v40 = vmul.f32 %v3817_v39, %v2623_v38  ;;  %v2644_v45 = vadd.f32 %v3330_v42, %v2636_v41  ;;  %v3347_v38 = vld [vmem:[%s5048_s2] ss:$0 sm:$0xff] }
 0xdb6   : > { %v2637_v43 = vmul.f32 %v3329_v36, %v2629_v40  ;;  %v2721_v34 = vrot.slane %v2644_v45, 7  ;;  %v2786_v61 = vrot.slane %v2644_v45, 1 }
 0xdb8   : > { %v2645_v46 = vadd.f32 %v3330_v42, %v2637_v43 }
 0xdba   : > { %v2658_v48 = vpack.c.bf16 %v2645_v46, %v2644_v45  ;;  %v2722_v50 = vrot.slane %v2645_v46, 7  ;;  %v2787_v63 = vrot.slane %v2645_v46, 1  ;;  %v3348_v45 = vld [vmem:[%s5049_s7] ss:$0 sm:$0xff] }
 0xdbc   : > { %3593 = vmatmul.mubr.msk.bf16.vlgmr.msra.gmra.mrb[0].mxu1 %vm2596_vm14, %v2658_v48  ;;  %v2723_v52 = vsel %vm1956_vm6, %v2721_v34, %v2722_v50  ;;  %v2724_v55 = vsel %vm1956_vm6, %v2722_v50, %v2721_v34  ;;  %v2788_v0 = vsel %vm2034_vm9, %v2786_v61, %v2787_v63  ;;  %v2789_v1 = vsel %vm2034_vm9, %v2787_v63, %v2786_v61  ;;  %v3349_v50 = vld [vmem:[%s5050_s28] ss:$0 sm:$0xff] }
 0xdbd   : > { %3597 = vmatpush3.bf16.msra.mxu1 %v3808_v47  ;;  %3600 = vmatprep.mubr.msk.bf16.mxu1 %vm4074_vm13, %v4073_v37  ;;  %v2725_v56 = vsel %vm1961_vm7, %v2724_v55, 0.0  ;;  %v2726_v58 = vsel %vm1962_vm8, %v2723_v52, 0.0  ;;  %v2790_v6 = vsel %vm2041_vm10, %v2788_v0, 0.0  ;;  %v2791_v2 = vsel %vm2042_vm11, %v2789_v1, 0.0 }
 0xdbe   : > { %3598 = vmatprep.subr.bf16.mxu1 %v4073_v37  ;;  %v2727_v59 = vpack.c.bf16 %v2726_v58, %v2725_v56  ;;  %v2792_v3 = vpack.c.bf16 %v2791_v2, %v2790_v6 }
 0xdc1   : > { %3599 = vmatpush3.bf16.msra.mxu1 %v2741_v51 }
 0xdc2   : > { %3604 = vmatprep.subr.bf16.mxu1 %v4073_v37 }
 0xdc8   : > { %3601 = vmatmul.mubr.msk.bf16.vlgmr.msra.gmra.mrb[0].mxu1 %vm2596_vm14, %v2727_v59 }
 0xdc9   : > { %3605 = vmatpush3.bf16.msra.mxu1 %v3810_v44  ;;  %3608 = vmatprep.mubr.msk.bf16.mxu1 %vm4074_vm13, %v4073_v37 }
 0xdca   : > { %3606 = vmatprep.subr.bf16.mxu1 %v4073_v37 }
 0xdcd   : > { %3607 = vmatpush3.bf16.msra.mxu1 %v2806_v60 }
 0xdd4   : > { %3609 = vmatmul.mubr.msk.bf16.vlgmr.msra.gmra.mrb[0].mxu1 %vm2596_vm14, %v2792_v3 }
 0xea7   : > { %v2842_v57 = vpop.f32.mrb[0].mxu1 }
 0xea8   : > { %v3642_v5 = vadd.f32 %v3337_v4, %v2842_v57  ;;  %v3610_v11 = vpop.f32.mrb[1].mxu1 }
 0xea9   : > { %v2845_v53 = vpop.f32.mrb[2].mxu1 }
 0xeaa   : > { %v2851_v8 = vmax.f32 %v3642_v5, 0.0  ;;  %v3643_v12 = vadd.f32 %v3337_v4, %v2845_v53  ;;  %v3611_v13 = vpop.f32.mrb[3].mxu1 }
 0xeac   : > { %v2852_v54 = vmax.f32 %v3643_v12, 0.0  ;;  %v2855_v7 = vsel %vm1129_vm2, %v2851_v8, 0.0  ;;  %v2863_v14 = vmul.f32 %v2851_v8, %v2851_v8 }
 0xead   : > { %2856 = vadd.xlane.f32.xlu0 %v2855_v7 }
 0xeae   : > { %v2858_v10 = vsel %vm1129_vm2, %v2852_v54, 0.0  ;;  %v2864_v15 = vmul.f32 %v2852_v54, %v2852_v54  ;;  %v2865_v16 = vsel %vm1129_vm2, %v2863_v14, 0.0 }
 0xeaf   : > { %2859 = vadd.xlane.f32.xlu1 %v2858_v10 }
 0xeb0   : > { %v2868_v17 = vsel %vm1129_vm2, %v2864_v15, 0.0 }
 0xeb1   : > { %2866 = vadd.xlane.f32.xlu0 %v2865_v16 }
 0xeb3   : > { %2869 = vadd.xlane.f32.xlu1 %v2868_v17 }
 0xf3a   : > { %v2857_v20 = vpop.xlane.xlu0 %2856 }
 0xf3b   : > { %v2861_v21 = vmul.f32 0.03125, %v2857_v20 }
 0xf3c   : > { %v2860_v22 = vpop.xlane.xlu1 %2859 }
 0xf3d   : > { %v2862_v23 = vmul.f32 0.03125, %v2860_v22  ;;  %v2873_v9 = vmul.f32 %v2861_v21, %v2861_v21  ;;  %v2879_v37 = vsub.f32 %v2851_v8, %v2861_v21 }
 0xf3e   : > { %v2867_v24 = vpop.xlane.xlu0 %2866 }
 0xf3f   : > { %v2871_v25 = vmul.f32 0.03125, %v2867_v24  ;;  %v2874_v27 = vmul.f32 %v2862_v23, %v2862_v23  ;;  %v2880_v39 = vsub.f32 %v2852_v54, %v2862_v23 }
 0xf40   : > { %v2870_v26 = vpop.xlane.xlu1 %2869 }
 0xf41   : > { %v2875_v28 = vsub.f32 %v2871_v25, %v2873_v9  ;;  %v2872_v29 = vmul.f32 0.03125, %v2870_v26 }
 0xf43   : > { %v2877_v30 = vmax.f32 %v2875_v28, 0.0  ;;  %v2876_v31 = vsub.f32 %v2872_v29, %v2874_v27 }
 0xf45   : > { %v2881_v32 = vadd.f32 1e-05, %v2877_v30  ;;  %v2878_v33 = vmax.f32 %v2876_v31, 0.0 }
 0xf47   : > { %3818 = vrsqrt.f32 %v2881_v32  ;;  %v2882_v35 = vadd.f32 1e-05, %v2878_v33 }
 0xf49   : > { %3820 = vrsqrt.f32 %v2882_v35 }
 0xf51   : > { %v3819_v36 = vpop.eup %3818 }
 0xf52   : > { %v2885_v40 = vmul.f32 %v3819_v36, %v2879_v37 }
 0xf53   : > { %v3821_v41 = vpop.eup %3820 }
 0xf54   : > { %v2886_v42 = vmul.f32 %v3821_v41, %v2880_v39  ;;  %v2893_v43 = vmul.f32 %v3347_v38, %v2885_v40 }
 0xf56   : > { %v2894_v46 = vmul.f32 %v3347_v38, %v2886_v42  ;;  %v2901_v47 = vadd.f32 %v3348_v45, %v2893_v43 }
 0xf58   : > { %v2902_v48 = vadd.f32 %v3348_v45, %v2894_v46 }
 0xf5a   : > { %v2907_v49 = vpack.c.bf16 %v2902_v48, %v2901_v47 }
 0xf5c   : > { %3617 = vmatmul.mubr.msk.bf16.vlgmr.msra.gmra.mrb[4].mxu0 %vm1129_vm2, %v2907_v49 }
0x102f   : > { %v2964_v51 = vpop.f32.mrb[4].mxu0 }
0x1030   : > { %v2965_v34 = vadd.f32 %v3349_v50, %v2964_v51  ;;  %v3618_v52 = vpop.f32.mrb[5].mxu0 }
0x1031   : > { %v2967_v55 = vpop.f32.mrb[6].mxu0 }
0x1032   : > { %2971 = vst [vmem:[#allocation12] sm:$0xff] %v2965_v34  ;;  %v2968_v56 = vadd.f32 %v3349_v50, %v2967_v55  ;;  %v3619_v58 = vpop.f32.mrb[7].mxu0 }
0x1034   : > { %2972 = vst [vmem:[#allocation12 + $0x8] sm:$0xff] %v2968_v56 }
0x1035 PF: > { %s5051_s22 = sld [smem:[#allocation23_spill]]  ;;  %s4075_s17 = smov [#allocation11]  }
0x1036   : > { %s2982_s25 = sshll.u32 %s4075_s17, 4  ;;  %s2983_s25 = int_to_ptr.vmem [resolvable:$true] %s2982_s25 }
0x1037   : > { %s3942_s5 = scalar_lea.vmem %s2983_s25, 256  ;;  %p3949_p0 = scmp.lt.s32.totalorder %s2983_s25, %s2983_s25 }
0x1038   : > { %p3943_p8 = scmp.ne.s32.totalorder %s2983_s25, %s3942_s5  ;;  %p3950_p9 = scmp.lt.s32.totalorder %s3942_s5, %s3942_s5 }
0x103a   : > { %p3951_p12 = por %p3950_p9, %p3949_p0 }
0x103b   : > { %p3692_p6 = scmp.eq.s32.totalorder %s5051_s22, 1 }
0x103d   : > { %p3944_p11 = pnand %p3943_p8, %p3692_p6 }
0x103f   : > { %p3945_p5 = pneg %p3944_p11 }
0x1041   : > { %p3952_p1 = pnand %p3951_p12, %p3945_p5 }
0x1043   : > { %3955 = shalt.err (!%p3952_p1)
}
0x1044   : > { %s5052_s30 = sld [smem:[#allocation45_spill]] }
0x104a   : > { %s5053_s9 = smov %s5052_s30  ;;  %s3956_s3 = scalar_lea.hbm %s5052_s30, 256 }
0x104b   : > { %p3957_p4 = scmp.ne.s32.totalorder %s5053_s9, %s3956_s3  ;;  %p3962_p2 = scmp.lt.u32.totalorder %s3956_s3, %s5053_s9 }
0x104d   : > { %p3958_p3 = pnand %p3957_p4, %p3692_p6 }
0x104f   : > { %p3959_p13 = pneg %p3958_p3 }
0x1051   : > { %p3964_p7 = pnand %p3962_p2, %p3959_p13 }
0x1053   : > { %3967 = shalt.err (!%p3964_p7)
}
0x1054   : > { %s4076_s8 = smov 128   ;;  %s4077_s1 = smov 8  }
0x1055   : > { %3671 = dma.vmem_to_hbm [thread:$0]  (%p3692_p6), %s2983_s25, 256, %s5053_s9, [#allocation5], %s4076_s8, %s4076_s8, %s4077_s1  }
0x1056   : > { %s4078_s2 = smov [#allocation12]  }
0x1057   : > { %s2998_s29 = sshll.u32 %s4078_s2, 4  ;;  %s2999_s29 = int_to_ptr.vmem [resolvable:$true] %s2998_s29 }
0x1058   : > { %s3968_s21 = scalar_lea.vmem %s2999_s29, 256  ;;  %p3975_p5 = scmp.lt.s32.totalorder %s2999_s29, %s2999_s29 }
0x1059   : > { %p3969_p10 = scmp.ne.s32.totalorder %s2999_s29, %s3968_s21  ;;  %p3976_p0 = scmp.lt.s32.totalorder %s3968_s21, %s3968_s21 }
0x105b   : > { %p3970_p8 = pnand %p3969_p10, %p3692_p6  ;;  %p3977_p9 = por %p3976_p0, %p3975_p5 }
0x105d   : > { %p3971_p11 = pneg %p3970_p8 }
0x105f   : > { %p3978_p12 = pnand %p3977_p9, %p3971_p11 }
0x1061   : > { %3981 = shalt.err (!%p3978_p12)
}
0x1062   : > { %s5054_s13 = sld [smem:[#allocation46_spill]] }
0x1068   : > { %s3982_s28 = scalar_lea.hbm %s5054_s13, 256 }
0x1069   : > { %p3983_p1 = scmp.ne.s32.totalorder %s5054_s13, %s3982_s28  ;;  %p3988_p13 = scmp.lt.u32.totalorder %s3982_s28, %s5054_s13 }
0x106b   : > { %p3984_p4 = pnand %p3983_p1, %p3692_p6 }
0x106d   : > { %p3985_p3 = pneg %p3984_p4 }
0x106f   : > { %p3990_p2 = pnand %p3988_p13, %p3985_p3 }
0x1071   : > { %3993 = shalt.err (!%p3990_p2)
}
0x1072   : > { %3673 = dma.vmem_to_hbm [thread:$0]  (%p3692_p6), %s2999_s29, 256, %s5054_s13, [#allocation13], %s4076_s8, %s4076_s8, %s4077_s1  }
0x1073   : > { %4031 = dma.done.wait (%p3692_p6), [#allocation5], 256  }
0x1074   : > { %4033 = vsyncadd (%p3692_p6), [#allocation5], 4294967040 }
0x1075   : > { %4035 = dma.done.wait (%p3692_p6), [#allocation13], 256  }
0x1076   : > { %4037 = vsyncadd (%p3692_p6), [#allocation13], 4294967040 }
0x1077 PF: > { %s5055_s3 = sld [smem:[#allocation22_spill]]  ;;  %s5056_s29 = sld [smem:[#allocation19_spill]] }
0x1078   : > { %s5057_s2 = sld [smem:[#allocation20_spill]]  ;;  %s5058_s6 = sld [smem:[#allocation25_spill]] }
0x1079   : > { %s5059_s30 = sld [smem:[#allocation21_spill]]  ;;  %s5060_s7 = sld [smem:[#allocation24_spill]] }
0x107d   : > { %s47_s3 = sadd.s32 1, %s5055_s3  }
0x107e   : > { %p44_p7 = scmp.ge.s32.totalorder %s47_s3, 4  }
0x1080   :  { %46 = sbr.rel (!%p44_p7) target bundleno = 32 (0x20), region = 243 }
0x1087   :  { %3018 = vsyncpa [#allocation4], 1 }
0x1088   :  { %3020 = vsyncpa [#allocation4 + $0x1], 1 }
0x1089   :  { %3021 = vsyncpa [#allocation7], 1 }
0x108a   :  { %3023 = vsyncpa [#allocation7 + $0x1], 1 }
0x108b   :  { %3024 = vsyncpa [#allocation10], 1 }
0x108c   :  { %3026 = vsyncpa [#allocation10 + $0x1], 1 }
0x108d   :  { %3027 = vsyncpa [#allocation5], 1 }
0x108e   :  { %3029 = vsyncpa [#allocation5 + $0x1], 1 }
0x108f   :  { %3030 = vsyncpa [#allocation13], 1 }

</bundles_post_ra>
